<compile_context>
chip_gen: v6e
topology: v6e:2x2x1
jax: 0.10.0
libtpu: 0.0.40
codegen_flags: <defaults>
</compile_context>

<pallas_src>
import math
import functools

import jax
import jax.numpy as jnp
from jax.experimental import pallas as pl
from jax.experimental.pallas import tpu as pltpu

BN_EPS = 1e-5


def _round_up(x, m):
    return ((x + m - 1) // m) * m


# ---------------------------------------------------------------------------
# In-kernel helpers
# ---------------------------------------------------------------------------
def _accumulate_stats(z, c_sc, sum_sc, sq_sc, *, n_rows, masked):
    """Accumulate shifted per-feature sums of one (tm, d) tile of z.

    sum_sc / sq_sc are (8, d) sublane-partial accumulators (pure VPU adds in the
    hot loop); c_sc holds a per-feature shift (first tile's mean) that keeps the
    one-pass variance numerically well conditioned.  Rows >= n_rows (padding)
    are masked out when `masked` is set.
    """
    i = pl.program_id(0)
    tm, d_out = z.shape

    @pl.when(i == 0)
    def _():
        sum_sc[...] = jnp.zeros_like(sum_sc)
        sq_sc[...] = jnp.zeros_like(sq_sc)
        c_sc[...] = jnp.mean(z, axis=0, keepdims=True)

    zc = z - c_sc[...]
    if masked:
        row = i * tm + jax.lax.broadcasted_iota(jnp.int32, (tm, 1), 0)
        zc = jnp.where(row < n_rows, zc, 0.0)
    zg = zc.reshape(tm // 8, 8, d_out)          # layout-trivial sublane-group split
    sum_sc[...] += jnp.sum(zg, axis=0)          # VPU adds across vreg groups
    sq_sc[...] += jnp.sum(zg * zg, axis=0)


def _finalize_bn(c_sc, sum_sc, sq_sc, gamma, beta, scale_ref, shift_ref, *, n_rows):
    """Fold accumulated stats into the BN affine: scale, shift (both (1, d))."""
    inv_n = jnp.float32(1.0 / n_rows)
    s = jnp.sum(sum_sc[...], axis=0, keepdims=True) * inv_n    # E[z - c]
    q = jnp.sum(sq_sc[...], axis=0, keepdims=True) * inv_n     # E[(z - c)^2]
    mean = c_sc[...] + s
    var = jnp.maximum(q - s * s, 0.0)
    scale = gamma * jax.lax.rsqrt(var + BN_EPS)
    scale_ref[...] = scale
    shift_ref[...] = beta - mean * scale


# ---------------------------------------------------------------------------
# Kernels
# ---------------------------------------------------------------------------
def _stats0_kernel(x_ref, w_ref, gamma_ref, beta_ref,
                   scale_ref, shift_ref,
                   c_sc, sum_sc, sq_sc, *, n_rows, masked):
    """Standalone stats pass for the first hidden layer (nothing to fuse into).
    The hidden Linear bias is omitted — it cancels under the batch-mean."""
    z = jnp.dot(x_ref[...].astype(jnp.bfloat16), w_ref[...],
                preferred_element_type=jnp.float32)
    _accumulate_stats(z, c_sc, sum_sc, sq_sc, n_rows=n_rows, masked=masked)

    @pl.when(pl.program_id(0) == pl.num_programs(0) - 1)
    def _():
        _finalize_bn(c_sc, sum_sc, sq_sc, gamma_ref[...], beta_ref[...],
                     scale_ref, shift_ref, n_rows=n_rows)


def _apply_stats_kernel(x_ref, w_ref, scale_ref, shift_ref,
                        wn_ref, gamma_ref, beta_ref,
                        y_ref, scale_n_ref, shift_n_ref,
                        c_sc, sum_sc, sq_sc, *, n_rows, masked):
    """Apply layer l (y = relu((x@W)*scale + shift), bf16 out) fused with the
    stats accumulation of layer l+1 (z_next = y @ W_next), so y is consumed
    straight from VMEM instead of re-streamed from HBM."""
    z = jnp.dot(x_ref[...].astype(jnp.bfloat16), w_ref[...],
                preferred_element_type=jnp.float32)
    y = jnp.maximum(z * scale_ref[...] + shift_ref[...], 0.0)
    yb = y.astype(jnp.bfloat16)
    y_ref[...] = yb

    zn = jnp.dot(yb, wn_ref[...], preferred_element_type=jnp.float32)
    _accumulate_stats(zn, c_sc, sum_sc, sq_sc, n_rows=n_rows, masked=masked)

    @pl.when(pl.program_id(0) == pl.num_programs(0) - 1)
    def _():
        _finalize_bn(c_sc, sum_sc, sq_sc, gamma_ref[...], beta_ref[...],
                     scale_n_ref, shift_n_ref, n_rows=n_rows)


def _apply_final_kernel(x_ref, w_ref, scale_ref, shift_ref, wf_ref, bf_ref, o_ref):
    """Last hidden layer's apply fused with the final Linear(inter -> 1)."""
    z = jnp.dot(x_ref[...].astype(jnp.bfloat16), w_ref[...],
                preferred_element_type=jnp.float32)
    y = jnp.maximum(z * scale_ref[...] + shift_ref[...], 0.0)
    out = jnp.sum(y * wf_ref[...], axis=-1, keepdims=True) + bf_ref[...]
    o_ref[...] = out.astype(o_ref.dtype)


def _final_linear_kernel(x_ref, wf_ref, bf_ref, o_ref):
    """layer_num == 1 path: plain Linear(in_num -> 1)."""
    x = x_ref[...].astype(jnp.float32)
    out = jnp.sum(x * wf_ref[...], axis=-1, keepdims=True) + bf_ref[...]
    o_ref[...] = out.astype(o_ref.dtype)


# ---------------------------------------------------------------------------
# pallas_call wrappers
# ---------------------------------------------------------------------------
def _layer_stats(x, w, gamma, beta, *, tm, n_rows, masked):
    r_pad, d_in = x.shape
    d_out = w.shape[1]
    kernel = functools.partial(_stats0_kernel, n_rows=n_rows, masked=masked)
    vec = pl.BlockSpec((1, d_out), lambda i: (0, 0))
    return pl.pallas_call(
        kernel,
        out_shape=(jax.ShapeDtypeStruct((1, d_out), jnp.float32),
                   jax.ShapeDtypeStruct((1, d_out), jnp.float32)),
        grid=(r_pad // tm,),
        in_specs=[
            pl.BlockSpec((tm, d_in), lambda i: (i, 0)),      # x tile
            pl.BlockSpec((d_in, d_out), lambda i: (0, 0)),   # W resident
            vec, vec,                                        # gamma, beta resident
        ],
        out_specs=(vec, vec),
        scratch_shapes=[pltpu.VMEM((1, d_out), jnp.float32),   # shift c
                        pltpu.VMEM((8, d_out), jnp.float32),   # sublane-partial sum
                        pltpu.VMEM((8, d_out), jnp.float32)],  # sublane-partial sumsq
        compiler_params=pltpu.CompilerParams(
            dimension_semantics=("arbitrary",)),
    )(x, w, gamma, beta)


def _fused_apply_stats(x, w, scale, shift, w_next, gamma_next, beta_next,
                       *, tm, n_rows, masked):
    r_pad, d_in = x.shape
    d_out = w.shape[1]
    d_next = w_next.shape[1]
    kernel = functools.partial(_apply_stats_kernel, n_rows=n_rows, masked=masked)
    vec_out = pl.BlockSpec((1, d_out), lambda i: (0, 0))
    vec_next = pl.BlockSpec((1, d_next), lambda i: (0, 0))
    return pl.pallas_call(
        kernel,
        out_shape=(jax.ShapeDtypeStruct((r_pad, d_out), jnp.bfloat16),
                   jax.ShapeDtypeStruct((1, d_next), jnp.float32),
                   jax.ShapeDtypeStruct((1, d_next), jnp.float32)),
        grid=(r_pad // tm,),
        in_specs=[
            pl.BlockSpec((tm, d_in), lambda i: (i, 0)),        # x tile
            pl.BlockSpec((d_in, d_out), lambda i: (0, 0)),     # W_l resident
            vec_out, vec_out,                                  # scale_l, shift_l
            pl.BlockSpec((d_out, d_next), lambda i: (0, 0)),   # W_{l+1} resident
            vec_next, vec_next,                                # gamma_{l+1}, beta_{l+1}
        ],
        out_specs=(pl.BlockSpec((tm, d_out), lambda i: (i, 0)),  # y tile (lane-dense)
                   vec_next, vec_next),                          # scale/shift_{l+1}
        scratch_shapes=[pltpu.VMEM((1, d_next), jnp.float32),
                        pltpu.VMEM((8, d_next), jnp.float32),
                        pltpu.VMEM((8, d_next), jnp.float32)],
        compiler_params=pltpu.CompilerParams(
            dimension_semantics=("arbitrary",)),
    )(x, w, scale, shift, w_next, gamma_next, beta_next)


def _fused_apply_final(x, w, scale, shift, wf_row, bf, *, tm):
    r_pad, d_in = x.shape
    d_out = w.shape[1]
    vec = pl.BlockSpec((1, d_out), lambda i: (0, 0))
    return pl.pallas_call(
        _apply_final_kernel,
        out_shape=jax.ShapeDtypeStruct((r_pad, 1), jnp.float32),
        grid=(r_pad // tm,),
        in_specs=[
            pl.BlockSpec((tm, d_in), lambda i: (i, 0)),
            pl.BlockSpec((d_in, d_out), lambda i: (0, 0)),
            vec, vec,                                        # scale, shift
            vec,                                             # final W as (1, d_out) row
            pl.BlockSpec((1, 1), lambda i: (0, 0)),          # final bias
        ],
        out_specs=pl.BlockSpec((tm, 1), lambda i: (i, 0)),
        compiler_params=pltpu.CompilerParams(
            dimension_semantics=("parallel",)),
    )(x, w, scale, shift, wf_row, bf)


def _final_linear(x, wf_row, bf, *, tm):
    r_pad, d_in = x.shape
    return pl.pallas_call(
        _final_linear_kernel,
        out_shape=jax.ShapeDtypeStruct((r_pad, 1), jnp.float32),
        grid=(r_pad // tm,),
        in_specs=[
            pl.BlockSpec((tm, d_in), lambda i: (i, 0)),
            pl.BlockSpec((1, d_in), lambda i: (0, 0)),
            pl.BlockSpec((1, 1), lambda i: (0, 0)),
        ],
        out_specs=pl.BlockSpec((tm, 1), lambda i: (i, 0)),
        compiler_params=pltpu.CompilerParams(
            dimension_semantics=("parallel",)),
    )(x, wf_row, bf)


# ---------------------------------------------------------------------------
# Parameter construction (deterministic, PyTorch-style default init)
# ---------------------------------------------------------------------------
def init_out_layer_params(key, in_num, layer_num, inter_num=512):
    """hidden: list of (W, b, gamma, beta), W: (din, inter_num); final: (W, b)."""
    hidden = []
    for i in range(layer_num - 1):
        din = in_num if i == 0 else inter_num
        key, kw, kb = jax.random.split(key, 3)
        bound = 1.0 / math.sqrt(din)
        W = jax.random.uniform(kw, (din, inter_num), jnp.float32, -bound, bound)
        b = jax.random.uniform(kb, (1, inter_num), jnp.float32, -bound, bound)
        gamma = jnp.ones((1, inter_num), jnp.float32)
        beta = jnp.zeros((1, inter_num), jnp.float32)
        hidden.append((W, b, gamma, beta))

    dlast = in_num if layer_num == 1 else inter_num
    key, kw, kb = jax.random.split(key, 3)
    bound = 1.0 / math.sqrt(dlast)
    Wf = jax.random.uniform(kw, (dlast, 1), jnp.float32, -bound, bound)
    bf = jax.random.uniform(kb, (1, 1), jnp.float32, -bound, bound)
    return hidden, (Wf, bf)


# ---------------------------------------------------------------------------
# Forward
# ---------------------------------------------------------------------------
def out_layer_forward(x, hidden_params, final_params, tm_target=512):
    """x: (batch, node_num, in_num) -> (batch, node_num, 1)"""
    b, n, d_in = x.shape
    r = b * n
    tm = min(tm_target, _round_up(r, 8))
    r_pad = _round_up(r, tm)
    masked = r_pad != r

    out = x.reshape(r, d_in)
    if masked:
        out = jnp.pad(out, ((0, r_pad - r), (0, 0)))   # zero rows, masked in stats

    wf, bf = final_params
    bf2 = bf.reshape(1, 1).astype(jnp.float32)
    n_hidden = len(hidden_params)

    if n_hidden == 0:
        wf_row = wf.reshape(1, -1).astype(jnp.float32)
        y = _final_linear(out, wf_row, bf2, tm=tm)
        return y[:r].reshape(b, n, 1)

    inter = hidden_params[0][0].shape[1]
    ip = _round_up(inter, 128)          # lane-dense feature width
    cpad = ip - inter

    padded = []
    for li, (w, _b_unused, gamma, beta) in enumerate(hidden_params):
        # Hidden Linear bias dropped: cancelled by training-mode BN batch-mean.
        # Zero-padded W cols + gamma=0/beta=0 keep padded features exactly 0.
        rpad_w = cpad if li > 0 else 0
        wp = jnp.pad(w, ((0, rpad_w), (0, cpad))).astype(jnp.bfloat16)
        gp = jnp.pad(gamma.reshape(1, -1), ((0, 0), (0, cpad))).astype(jnp.float32)
        bp = jnp.pad(beta.reshape(1, -1), ((0, 0), (0, cpad))).astype(jnp.float32)
        padded.append((wp, gp, bp))

    wf_row = jnp.pad(wf.reshape(1, -1), ((0, 0), (0, cpad))).astype(jnp.float32)

    # Pass 1 for the first hidden layer only; subsequent stats are fused into
    # the previous layer's apply pass.
    w0, g0, b0 = padded[0]
    scale, shift = _layer_stats(out, w0, g0, b0, tm=tm, n_rows=r, masked=masked)

    y = None
    for li in range(n_hidden):
        wp, _, _ = padded[li]
        if li < n_hidden - 1:
            wn, gn, bn = padded[li + 1]
            out, scale, shift = _fused_apply_stats(
                out, wp, scale, shift, wn, gn, bn, tm=tm, n_rows=r, masked=masked)
        else:
            y = _fused_apply_final(out, wp, scale, shift, wf_row, bf2, tm=tm)

    return y[:r].reshape(b, n, 1)


# ---------------------------------------------------------------------------
# Reference (pure JAX, original PyTorch semantics incl. hidden biases;
# same bf16 matmul-input precision as the kernels)
# ---------------------------------------------------------------------------
def out_layer_ref(x, hidden_params, final_params):
    b, n, d_in = x.shape
    out = x.reshape(b * n, d_in).astype(jnp.float32)
    for (w, bias, gamma, beta) in hidden_params:
        z = jnp.dot(out.astype(jnp.bfloat16), w.astype(jnp.bfloat16),
                    preferred_element_type=jnp.float32) + bias
        mean = jnp.mean(z, axis=0, keepdims=True)
        var = jnp.mean((z - mean) ** 2, axis=0, keepdims=True)
        z = gamma * (z - mean) * jax.lax.rsqrt(var + BN_EPS) + beta
        out = jnp.maximum(z, 0.0)
    wf, bf = final_params
    out = out @ wf + bf
    return out.reshape(b, n, 1)


# ---------------------------------------------------------------------------
if __name__ == "__main__":
    # Shapes chosen to exercise both lane padding (inter 64 -> 128) and row
    # padding/masking (R = 2*500 = 1000 -> padded to 1024, tm = 512, grid (2,)).
    batch, node_num, in_num = 2, 500, 32
    layer_num, inter_num = 3, 64

    key = jax.random.PRNGKey(0)
    key, kx = jax.random.split(key)
    x = jax.random.normal(kx, (batch, node_num, in_num), jnp.float32)

    hidden_params, final_params = init_out_layer_params(
        key, in_num, layer_num, inter_num
    )

    y = out_layer_forward(x, hidden_params, final_params)
    y = jax.block_until_ready(y)

    y_ref = out_layer_ref(x, hidden_params, final_params)
    assert y.shape == (batch, node_num, 1)
    max_err = float(jnp.max(jnp.abs(y - y_ref)))
    assert jnp.allclose(y, y_ref, atol=1e-2, rtol=1e-2), f"mismatch vs ref: {max_err}"

    print("KERNEL_OK")
</pallas_src>

<mosaic_0001>
module attributes {stable_mosaic.version = 11 : i64} {
  func.func @_stats0_kernel(%arg0: i32, %arg1: memref<512x32xf32, #tpu.memory_space<vmem>>, %arg2: memref<32x128xbf16, #tpu.memory_space<vmem>>, %arg3: memref<1x128xf32, #tpu.memory_space<vmem>>, %arg4: memref<1x128xf32, #tpu.memory_space<vmem>>, %arg5: memref<1x128xf32, #tpu.memory_space<vmem>>, %arg6: memref<1x128xf32, #tpu.memory_space<vmem>>, %arg7: memref<1x128xf32, #tpu.memory_space<vmem>>, %arg8: memref<8x128xf32, #tpu.memory_space<vmem>>, %arg9: memref<8x128xf32, #tpu.memory_space<vmem>>) attributes {dimension_semantics = [#tpu.dimension_semantics<arbitrary>], iteration_bounds = array<i64: 2>, scalar_prefetch = 0 : i64, scratch_operands = 3 : i64, tpu.core_type = #tpu.core_type<tc>, window_params = [{transform_indices = @transform_0, window_bounds = array<i64: 512, 32>}, {pipeline_mode = #tpu.pipeline_mode<synchronous>, transform_indices = @transform_1, window_bounds = array<i64: 32, 128>}, {pipeline_mode = #tpu.pipeline_mode<synchronous>, transform_indices = @transform_2, window_bounds = array<i64: 1, 128>}, {pipeline_mode = #tpu.pipeline_mode<synchronous>, transform_indices = @transform_3, window_bounds = array<i64: 1, 128>}, {pipeline_mode = #tpu.pipeline_mode<synchronous>, transform_indices = @transform_4, window_bounds = array<i64: 1, 128>}, {pipeline_mode = #tpu.pipeline_mode<synchronous>, transform_indices = @transform_5, window_bounds = array<i64: 1, 128>}]} {
    %c0 = arith.constant 0 : index
    %c0_0 = arith.constant 0 : index
    %0 = vector.load %arg1[%c0, %c0_0] : memref<512x32xf32, #tpu.memory_space<vmem>>, vector<512x32xf32>
    %1 = arith.truncf %0 : vector<512x32xf32> to vector<512x32xbf16>
    %c0_1 = arith.constant 0 : index
    %c0_2 = arith.constant 0 : index
    %2 = vector.load %arg2[%c0_1, %c0_2] : memref<32x128xbf16, #tpu.memory_space<vmem>>, vector<32x128xbf16>
    %cst = arith.constant dense<0.000000e+00> : vector<512x128xf32>
    %3 = tpu.matmul %1, %2, %cst {dimension_numbers = #tpu.dot_dimension_numbers<[1], [0], [0], [1], [0, 0, 1, 1], [], []>} : vector<512x32xbf16>, vector<32x128xbf16>, vector<512x128xf32> -> vector<512x128xf32>
    %c0_i32 = arith.constant 0 : i32
    %4 = arith.cmpi eq, %arg0, %c0_i32 : i32
    %5 = arith.extui %4 : i1 to i32
    %c0_i32_3 = arith.constant 0 : i32
    %6 = arith.cmpi ne, %5, %c0_i32_3 : i32
    scf.if %6 {
      %cst_18 = arith.constant 0.000000e+00 : f32
      %33 = vector.broadcast %cst_18 : f32 to vector<8x128xf32>
      %c0_19 = arith.constant 0 : index
      %c0_20 = arith.constant 0 : index
      %34 = vector.load %arg8[%c0_19, %c0_20] : memref<8x128xf32, #tpu.memory_space<vmem>>, vector<8x128xf32>
      tpu.vector_store %arg8[%c0_19, %c0_20], %33 {strides = array<i32>} : memref<8x128xf32, #tpu.memory_space<vmem>>, vector<8x128xf32>,
      %cst_21 = arith.constant 0.000000e+00 : f32
      %35 = vector.broadcast %cst_21 : f32 to vector<8x128xf32>
      %c0_22 = arith.constant 0 : index
      %c0_23 = arith.constant 0 : index
      %36 = vector.load %arg9[%c0_22, %c0_23] : memref<8x128xf32, #tpu.memory_space<vmem>>, vector<8x128xf32>
      tpu.vector_store %arg9[%c0_22, %c0_23], %35 {strides = array<i32>} : memref<8x128xf32, #tpu.memory_space<vmem>>, vector<8x128xf32>,
      %cst_24 = arith.constant dense<0.000000e+00> : vector<128xf32>
      %37 = vector.multi_reduction <add>, %3, %cst_24 [0] : vector<512x128xf32> to vector<128xf32>
      %38 = vector.shape_cast %37 : vector<128xf32> to vector<1x128xf32>
      %cst_25 = arith.constant 5.120000e+02 : f32
      %39 = vector.broadcast %cst_25 : f32 to vector<1x128xf32>
      %40 = arith.divf %38, %39 : vector<1x128xf32>
      %c0_26 = arith.constant 0 : index
      %c0_27 = arith.constant 0 : index
      %41 = vector.load %arg7[%c0_26, %c0_27] : memref<1x128xf32, #tpu.memory_space<vmem>>, vector<1x128xf32>
      tpu.vector_store %arg7[%c0_26, %c0_27], %40 {strides = array<i32>} : memref<1x128xf32, #tpu.memory_space<vmem>>, vector<1x128xf32>,
    } else {
    }
    %c0_4 = arith.constant 0 : index
    %c0_5 = arith.constant 0 : index
    %7 = vector.load %arg7[%c0_4, %c0_5] : memref<1x128xf32, #tpu.memory_space<vmem>>, vector<1x128xf32>
    %8 = vector.broadcast %7 : vector<1x128xf32> to vector<512x128xf32>
    %9 = arith.subf %3, %8 : vector<512x128xf32>
    %c512_i32 = arith.constant 512 : i32
    %10 = arith.muli %arg0, %c512_i32 : i32
    %11 = tpu.iota {dimensions = array<i32: 0>} : vector<512x1xi32>
    %12 = vector.broadcast %10 : i32 to vector<512x1xi32>
    %13 = arith.addi %12, %11 : vector<512x1xi32>
    %c1000_i32 = arith.constant 1000 : i32
    %14 = vector.broadcast %c1000_i32 : i32 to vector<512x1xi32>
    %15 = arith.cmpi slt, %13, %14 : vector<512x1xi32>
    %cst_6 = arith.constant 0.000000e+00 : f32
    %16 = vector.shape_cast %15 : vector<512x1xi1> to vector<512x1xi1>
    %17 = vector.broadcast %16 : vector<512x1xi1> to vector<512x128xi1>
    %18 = vector.broadcast %cst_6 : f32 to vector<512x128xf32>
    %19 = arith.select %17, %9, %18 : vector<512x128xi1>, vector<512x128xf32>
    %20 = vector.shape_cast %19 : vector<512x128xf32> to vector<64x8x128xf32>
    %c0_7 = arith.constant 0 : index
    %c0_8 = arith.constant 0 : index
    %21 = vector.load %arg8[%c0_7, %c0_8] : memref<8x128xf32, #tpu.memory_space<vmem>>, vector<8x128xf32>
    %cst_9 = arith.constant dense<0.000000e+00> : vector<8x128xf32>
    %22 = vector.multi_reduction <add>, %20, %cst_9 [0] : vector<64x8x128xf32> to vector<8x128xf32>
    %23 = arith.addf %21, %22 : vector<8x128xf32>
    %c0_10 = arith.constant 0 : index
    %c0_11 = arith.constant 0 : index
    %24 = vector.load %arg8[%c0_10, %c0_11] : memref<8x128xf32, #tpu.memory_space<vmem>>, vector<8x128xf32>
    tpu.vector_store %arg8[%c0_10, %c0_11], %23 {strides = array<i32>} : memref<8x128xf32, #tpu.memory_space<vmem>>, vector<8x128xf32>,
    %c0_12 = arith.constant 0 : index
    %c0_13 = arith.constant 0 : index
    %25 = vector.load %arg9[%c0_12, %c0_13] : memref<8x128xf32, #tpu.memory_space<vmem>>, vector<8x128xf32>
    %26 = arith.mulf %20, %20 : vector<64x8x128xf32>
    %cst_14 = arith.constant dense<0.000000e+00> : vector<8x128xf32>
    %27 = vector.multi_reduction <add>, %26, %cst_14 [0] : vector<64x8x128xf32> to vector<8x128xf32>
    %28 = arith.addf %25, %27 : vector<8x128xf32>
    %c0_15 = arith.constant 0 : index
    %c0_16 = arith.constant 0 : index
    %29 = vector.load %arg9[%c0_15, %c0_16] : memref<8x128xf32, #tpu.memory_space<vmem>>, vector<8x128xf32>
    tpu.vector_store %arg9[%c0_15, %c0_16], %28 {strides = array<i32>} : memref<8x128xf32, #tpu.memory_space<vmem>>, vector<8x128xf32>,
    %c1_i32 = arith.constant 1 : i32
    %30 = arith.cmpi eq, %arg0, %c1_i32 : i32
    %31 = arith.extui %30 : i1 to i32
    %c0_i32_17 = arith.constant 0 : i32
    %32 = arith.cmpi ne, %31, %c0_i32_17 : i32
    scf.if %32 {
      %c0_18 = arith.constant 0 : index
      %c0_19 = arith.constant 0 : index
      %33 = vector.load %arg3[%c0_18, %c0_19] : memref<1x128xf32, #tpu.memory_space<vmem>>, vector<1x128xf32>
      %c0_20 = arith.constant 0 : index
      %c0_21 = arith.constant 0 : index
      %34 = vector.load %arg4[%c0_20, %c0_21] : memref<1x128xf32, #tpu.memory_space<vmem>>, vector<1x128xf32>
      %c0_22 = arith.constant 0 : index
      %c0_23 = arith.constant 0 : index
      %35 = vector.load %arg8[%c0_22, %c0_23] : memref<8x128xf32, #tpu.memory_space<vmem>>, vector<8x128xf32>
      %cst_24 = arith.constant dense<0.000000e+00> : vector<128xf32>
      %36 = vector.multi_reduction <add>, %35, %cst_24 [0] : vector<8x128xf32> to vector<128xf32>
      %37 = vector.shape_cast %36 : vector<128xf32> to vector<1x128xf32>
      %cst_25 = arith.constant 1.000000e-03 : f32
      %38 = vector.broadcast %cst_25 : f32 to vector<1x128xf32>
      %39 = arith.mulf %37, %38 : vector<1x128xf32>
      %c0_26 = arith.constant 0 : index
      %c0_27 = arith.constant 0 : index
      %40 = vector.load %arg9[%c0_26, %c0_27] : memref<8x128xf32, #tpu.memory_space<vmem>>, vector<8x128xf32>
      %cst_28 = arith.constant dense<0.000000e+00> : vector<128xf32>
      %41 = vector.multi_reduction <add>, %40, %cst_28 [0] : vector<8x128xf32> to vector<128xf32>
      %42 = vector.shape_cast %41 : vector<128xf32> to vector<1x128xf32>
      %cst_29 = arith.constant 1.000000e-03 : f32
      %43 = vector.broadcast %cst_29 : f32 to vector<1x128xf32>
      %44 = arith.mulf %42, %43 : vector<1x128xf32>
      %c0_30 = arith.constant 0 : index
      %c0_31 = arith.constant 0 : index
      %45 = vector.load %arg7[%c0_30, %c0_31] : memref<1x128xf32, #tpu.memory_space<vmem>>, vector<1x128xf32>
      %46 = arith.addf %45, %39 : vector<1x128xf32>
      %47 = arith.mulf %39, %39 : vector<1x128xf32>
      %48 = arith.subf %44, %47 : vector<1x128xf32>
      %cst_32 = arith.constant 0.000000e+00 : f32
      %49 = vector.broadcast %cst_32 : f32 to vector<1x128xf32>
      %50 = arith.maximumf %48, %49 : vector<1x128xf32>
      %cst_33 = arith.constant 9.99999974E-6 : f32
      %51 = vector.broadcast %cst_33 : f32 to vector<1x128xf32>
      %52 = arith.addf %50, %51 : vector<1x128xf32>
      %53 = math.rsqrt %52 : vector<1x128xf32>
      %54 = arith.mulf %33, %53 : vector<1x128xf32>
      %c0_34 = arith.constant 0 : index
      %c0_35 = arith.constant 0 : index
      %55 = vector.load %arg5[%c0_34, %c0_35] : memref<1x128xf32, #tpu.memory_space<vmem>>, vector<1x128xf32>
      tpu.vector_store %arg5[%c0_34, %c0_35], %54 {strides = array<i32>} : memref<1x128xf32, #tpu.memory_space<vmem>>, vector<1x128xf32>,
      %56 = arith.mulf %46, %54 : vector<1x128xf32>
      %57 = arith.subf %34, %56 : vector<1x128xf32>
      %c0_36 = arith.constant 0 : index
      %c0_37 = arith.constant 0 : index
      %58 = vector.load %arg6[%c0_36, %c0_37] : memref<1x128xf32, #tpu.memory_space<vmem>>, vector<1x128xf32>
      tpu.vector_store %arg6[%c0_36, %c0_37], %57 {strides = array<i32>} : memref<1x128xf32, #tpu.memory_space<vmem>>, vector<1x128xf32>,
    } else {
    }
    return
  }
  func.func @transform_0(%arg0: i32) -> (i32, i32) {
    %c0_i32 = arith.constant 0 : i32
    %c0_i32_0 = arith.constant 0 : i32
    return %arg0, %c0_i32 : i32, i32
  }
  func.func @transform_1(%arg0: i32) -> (i32, i32) {
    %c0_i32 = arith.constant 0 : i32
    %c0_i32_0 = arith.constant 0 : i32
    %c0_i32_1 = arith.constant 0 : i32
    return %c0_i32, %c0_i32_0 : i32, i32
  }
  func.func @transform_2(%arg0: i32) -> (i32, i32) {
    %c0_i32 = arith.constant 0 : i32
    %c0_i32_0 = arith.constant 0 : i32
    %c0_i32_1 = arith.constant 0 : i32
    return %c0_i32, %c0_i32_0 : i32, i32
  }
  func.func @transform_3(%arg0: i32) -> (i32, i32) {
    %c0_i32 = arith.constant 0 : i32
    %c0_i32_0 = arith.constant 0 : i32
    %c0_i32_1 = arith.constant 0 : i32
    return %c0_i32, %c0_i32_0 : i32, i32
  }
  func.func @transform_4(%arg0: i32) -> (i32, i32) {
    %c0_i32 = arith.constant 0 : i32
    %c0_i32_0 = arith.constant 0 : i32
    %c0_i32_1 = arith.constant 0 : i32
    return %c0_i32, %c0_i32_0 : i32, i32
  }
  func.func @transform_5(%arg0: i32) -> (i32, i32) {
    %c0_i32 = arith.constant 0 : i32
    %c0_i32_0 = arith.constant 0 : i32
    %c0_i32_1 = arith.constant 0 : i32
    return %c0_i32, %c0_i32_0 : i32, i32
  }
}

</mosaic_0001>

<bundles_post_ra>
// kernel: tpu_custom_call.1
= control target key start
LH: loop header
LB: loop body
LE: loop exit
PB: predicated region body
PF: predicated region fallthrough
CT: control target
= control target key end

     0   :  { %11 = vsyncpa [#allocation6], 0  ;;  %s2946_s0 = inlined_call_operand.vmem [shape: f32[1024,32], index: 0, kind: input, shape index: {}]   ;;  %s2947_s1 = inlined_call_operand.vmem [shape: bf16[32,128], index: 1, kind: input, shape index: {}]   ;;  %s2948_s2 = inlined_call_operand.vmem [shape: f32[1,128], index: 2, kind: input, shape index: {}]   ;;  %s2949_s3 = inlined_call_operand.vmem [shape: f32[1,128], index: 3, kind: input, shape index: {}]   ;;  %s2950_s4 = inlined_call_operand.hbm [shape: f32[1,128], index: 4, kind: output, shape index: {0}]   ;;  %s2951_s5 = inlined_call_operand.hbm [shape: f32[1,128], index: 5, kind: output, shape index: {1}]  }
   0x1   :  { %12 = vsyncpa [#allocation8], 0  ;;  %s1825_s18 = smov 0  }
   0x2 LB: > { %s1831_s19 = sadd.s32 4294967295, %s1790_s18   ;;  %p1548_p0 = scmp.ge.s32.totalorder %s1790_s18, 1  ;;  %s1790_s18 = sphi %s1825_s18, %s18_s18  }
   0x3   : > { %p183_p1 = scmp.lt.s32.totalorder %s1790_s18, 3 }
   0x5   : > { %p184_p2 = pnand %p1548_p0, %p183_p1 }
   0x7   : > { %187 = sbr.rel (%p184_p2) target bundleno = 690 (0x2b2), region = 36 }
   0xc   : > { %v1724_v0 = vld [vmem:[%s2947_s1 + $0x8] sm:$0xff]   ;;  %s1549_s22 = sshll.u32 %s1831_s19, 6  ;;  %v1725_v1 = vld [vmem:[%s2947_s1] sm:$0xff]   ;;  %vm325_vm0 = vcmask 261120   ;;  %p1585_p4 = scmp.ne.s32.totalorder %s1831_s19, 0 }
   0xd   : > { %p207_p3 = scmp.lt.s32.totalorder %s1549_s22, 127  ;;  %1629 = vmatprep.subr.bf16.mxu0 %v1724_v0  ;;  %1697 = vmatprep.subr.bf16.mxu1 %v1724_v0 }
   0xe   : > { %1630 = vmatpush3.bf16.msra.mxu0 %v1724_v0  ;;  %1699 = vmatpush3.bf16.msra.mxu1 %v1724_v0 }
   0xf   : > { %s3201_s22 = smov (!%p207_p3, %s1549_s22), 127  ;;  %1631 = vmatprep.subr.bf16.mxu0 %v1725_v1  ;;  %1698 = vmatprep.subr.bf16.mxu1 %v1725_v1 }
  0x10   : > { %s1550_s25 = sshll.u32 %s3201_s22, 3 }
  0x11   : > { %s1845_s28 = scalar_lea.vmem %s2946_s0, %s1550_s25 }
  0x12   : > { %1632 = vmatpush3.bf16.msra.mxu0 %v1725_v1  ;;  %1700 = vmatpush3.bf16.msra.mxu1 %v1725_v1  ;;  %v213_v2 = vld [vmem:[%s1845_s28] sm:$0xff]  ;;  %v214_v3 = vld [vmem:[%s1845_s28 + $0x8] sm:$0xff]  ;;  %v215_v7 = vld [vmem:[%s1845_s28 + $0x10] sm:$0xff] }
  0x13   : > { %v245_v4 = vld [vmem:[%s1845_s28 + $0x100] sm:$0xff]  ;;  %v277_v5 = vpack.c.bf16 %v214_v3, %v213_v2  ;;  %v246_v6 = vld [vmem:[%s1845_s28 + $0x108] sm:$0xff]  ;;  %v216_v8 = vld [vmem:[%s1845_s28 + $0x18] sm:$0xff] }
  0x14   : > { %v293_v9 = vpack.c.bf16 %v246_v6, %v245_v4  ;;  %v278_v10 = vpack.c.bf16 %v216_v8, %v215_v7  ;;  %v247_v11 = vld [vmem:[%s1845_s28 + $0x110] sm:$0xff]  ;;  %v248_v12 = vld [vmem:[%s1845_s28 + $0x118] sm:$0xff]  ;;  %v217_v13 = vld [vmem:[%s1845_s28 + $0x20] sm:$0xff] }
  0x15   : > { %1633 = vmatprep.mubr.msk.bf16.mxu0 %vm325_vm0, %v277_v5  ;;  %v294_v14 = vpack.c.bf16 %v248_v12, %v247_v11  ;;  %v218_v15 = vld [vmem:[%s1845_s28 + $0x28] sm:$0xff]  ;;  %v249_v16 = vld [vmem:[%s1845_s28 + $0x120] sm:$0xff]  ;;  %v219_v20 = vld [vmem:[%s1845_s28 + $0x30] sm:$0xff] }
  0x16   : > { %v250_v17 = vld [vmem:[%s1845_s28 + $0x128] sm:$0xff]  ;;  %1665 = vmatprep.mubr.msk.bf16.mxu1 %vm325_vm0, %v293_v9  ;;  %1634 = vmatmul.mubr.msk.bf16.vlgmr.msra.gmra.mxu0 %vm325_vm0, %v278_v10  ;;  %v279_v18 = vpack.c.bf16 %v218_v15, %v217_v13  ;;  %v220_v21 = vld [vmem:[%s1845_s28 + $0x38] sm:$0xff]  ;;  %v251_v22 = vld [vmem:[%s1845_s28 + $0x130] sm:$0xff] }
  0x17   : > { %v295_v19 = vpack.c.bf16 %v250_v17, %v249_v16  ;;  %1666 = vmatmul.mubr.msk.bf16.vlgmr.msra.gmra.mxu1 %vm325_vm0, %v294_v14  ;;  %v252_v23 = vld [vmem:[%s1845_s28 + $0x138] sm:$0xff]  ;;  %v221_v24 = vld [vmem:[%s1845_s28 + $0x40] sm:$0xff]  ;;  %v222_v25 = vld [vmem:[%s1845_s28 + $0x48] sm:$0xff]  ;;  %v280_v28 = vpack.c.bf16 %v220_v21, %v219_v20 }
  0x18   : > { %1637 = vmatprep.mubr.msk.bf16.mxu0 %vm325_vm0, %v279_v18  ;;  %v253_v26 = vld [vmem:[%s1845_s28 + $0x140] sm:$0xff]  ;;  %v254_v27 = vld [vmem:[%s1845_s28 + $0x148] sm:$0xff]  ;;  %v296_v29 = vpack.c.bf16 %v252_v23, %v251_v22  ;;  %v281_v30 = vpack.c.bf16 %v222_v25, %v221_v24  ;;  %v223_v32 = vld [vmem:[%s1845_s28 + $0x50] sm:$0xff] }
  0x19   : > { %1669 = vmatprep.mubr.msk.bf16.mxu1 %vm325_vm0, %v295_v19  ;;  %v297_v31 = vpack.c.bf16 %v254_v27, %v253_v26  ;;  %v224_v33 = vld [vmem:[%s1845_s28 + $0x58] sm:$0xff]  ;;  %v255_v34 = vld [vmem:[%s1845_s28 + $0x150] sm:$0xff]  ;;  %v225_v36 = vld [vmem:[%s1845_s28 + $0x60] sm:$0xff] }
  0x1a   : > { %v256_v35 = vld [vmem:[%s1845_s28 + $0x158] sm:$0xff]  ;;  %v226_v37 = vld [vmem:[%s1845_s28 + $0x68] sm:$0xff]  ;;  %v257_v38 = vld [vmem:[%s1845_s28 + $0x160] sm:$0xff]  ;;  %v282_v40 = vpack.c.bf16 %v224_v33, %v223_v32 }
  0x1b   : > { %v258_v39 = vld [vmem:[%s1845_s28 + $0x168] sm:$0xff]  ;;  %v298_v41 = vpack.c.bf16 %v256_v35, %v255_v34  ;;  %v283_v42 = vpack.c.bf16 %v226_v37, %v225_v36  ;;  %v227_v44 = vld [vmem:[%s1845_s28 + $0x70] sm:$0xff]  ;;  %v228_v45 = vld [vmem:[%s1845_s28 + $0x78] sm:$0xff] }
  0x1c   : > { %v299_v43 = vpack.c.bf16 %v258_v39, %v257_v38  ;;  %v259_v46 = vld [vmem:[%s1845_s28 + $0x170] sm:$0xff]  ;;  %v260_v47 = vld [vmem:[%s1845_s28 + $0x178] sm:$0xff]  ;;  %v229_v48 = vld [vmem:[%s1845_s28 + $0x80] sm:$0xff]  ;;  %v284_v52 = vpack.c.bf16 %v228_v45, %v227_v44 }
  0x1d   : > { %v230_v49 = vld [vmem:[%s1845_s28 + $0x88] sm:$0xff]  ;;  %v261_v50 = vld [vmem:[%s1845_s28 + $0x180] sm:$0xff]  ;;  %v300_v53 = vpack.c.bf16 %v260_v47, %v259_v46  ;;  %v231_v56 = vld [vmem:[%s1845_s28 + $0x90] sm:$0xff] }
  0x1e   : > { %1638 = vmatmul.mubr.msk.bf16.gmra.mxu0 %vm325_vm0, %v280_v28  ;;  %v262_v51 = vld [vmem:[%s1845_s28 + $0x188] sm:$0xff]  ;;  %v285_v54 = vpack.c.bf16 %v230_v49, %v229_v48  ;;  %v232_v57 = vld [vmem:[%s1845_s28 + $0x98] sm:$0xff]  ;;  %v263_v58 = vld [vmem:[%s1845_s28 + $0x190] sm:$0xff] }
  0x1f   : > { %1670 = vmatmul.mubr.msk.bf16.gmra.mxu1 %vm325_vm0, %v296_v29  ;;  %1641 = vmatprep.mubr.msk.bf16.mxu0 %vm325_vm0, %v281_v30  ;;  %v301_v55 = vpack.c.bf16 %v262_v51, %v261_v50  ;;  %v264_v59 = vld [vmem:[%s1845_s28 + $0x198] sm:$0xff]  ;;  %v233_v60 = vld [vmem:[%s1845_s28 + $0xa0] sm:$0xff]  ;;  %v234_v61 = vld [vmem:[%s1845_s28 + $0xa8] sm:$0xff]  ;;  %v286_v0 = vpack.c.bf16 %v232_v57, %v231_v56 }
  0x20   : > { %1673 = vmatprep.mubr.msk.bf16.mxu1 %vm325_vm0, %v297_v31  ;;  %v265_v62 = vld [vmem:[%s1845_s28 + $0x1a0] sm:$0xff]  ;;  %v266_v63 = vld [vmem:[%s1845_s28 + $0x1a8] sm:$0xff]  ;;  %v302_v1 = vpack.c.bf16 %v264_v59, %v263_v58  ;;  %v287_v2 = vpack.c.bf16 %v234_v61, %v233_v60  ;;  %v235_v4 = vld [vmem:[%s1845_s28 + $0xb0] sm:$0xff] }
  0x21   : > { %v303_v3 = vpack.c.bf16 %v266_v63, %v265_v62  ;;  %v236_v5 = vld [vmem:[%s1845_s28 + $0xb8] sm:$0xff]  ;;  %v267_v6 = vld [vmem:[%s1845_s28 + $0x1b0] sm:$0xff]  ;;  %v237_v8 = vld [vmem:[%s1845_s28 + $0xc0] sm:$0xff] }
  0x22   : > { %v268_v7 = vld [vmem:[%s1845_s28 + $0x1b8] sm:$0xff]  ;;  %v238_v9 = vld [vmem:[%s1845_s28 + $0xc8] sm:$0xff]  ;;  %v269_v10 = vld [vmem:[%s1845_s28 + $0x1c0] sm:$0xff]  ;;  %v288_v12 = vpack.c.bf16 %v236_v5, %v235_v4 }
  0x23   : > { %v270_v11 = vld [vmem:[%s1845_s28 + $0x1c8] sm:$0xff]  ;;  %v304_v13 = vpack.c.bf16 %v268_v7, %v267_v6  ;;  %v289_v14 = vpack.c.bf16 %v238_v9, %v237_v8  ;;  %v239_v16 = vld [vmem:[%s1845_s28 + $0xd0] sm:$0xff]  ;;  %v240_v17 = vld [vmem:[%s1845_s28 + $0xd8] sm:$0xff] }
  0x24   : > { %v305_v15 = vpack.c.bf16 %v270_v11, %v269_v10  ;;  %v271_v18 = vld [vmem:[%s1845_s28 + $0x1d0] sm:$0xff]  ;;  %v272_v19 = vld [vmem:[%s1845_s28 + $0x1d8] sm:$0xff]  ;;  %v241_v20 = vld [vmem:[%s1845_s28 + $0xe0] sm:$0xff]  ;;  %v290_v24 = vpack.c.bf16 %v240_v17, %v239_v16 }
  0x25   : > { %v242_v21 = vld [vmem:[%s1845_s28 + $0xe8] sm:$0xff]  ;;  %v273_v22 = vld [vmem:[%s1845_s28 + $0x1e0] sm:$0xff]  ;;  %v306_v25 = vpack.c.bf16 %v272_v19, %v271_v18  ;;  %v243_v28 = vld [vmem:[%s1845_s28 + $0xf0] sm:$0xff] }
  0x26   : > { %1642 = vmatmul.mubr.msk.bf16.gmra.mxu0 %vm325_vm0, %v282_v40  ;;  %v274_v23 = vld [vmem:[%s1845_s28 + $0x1e8] sm:$0xff]  ;;  %v291_v26 = vpack.c.bf16 %v242_v21, %v241_v20  ;;  %v244_v29 = vld [vmem:[%s1845_s28 + $0xf8] sm:$0xff]  ;;  %v275_v30 = vld [vmem:[%s1845_s28 + $0x1f0] sm:$0xff] }
  0x27   : > { %1674 = vmatmul.mubr.msk.bf16.gmra.mxu1 %vm325_vm0, %v298_v41  ;;  %1645 = vmatprep.mubr.msk.bf16.mxu0 %vm325_vm0, %v283_v42  ;;  %v307_v27 = vpack.c.bf16 %v274_v23, %v273_v22  ;;  %v276_v31 = vld [vmem:[%s1845_s28 + $0x1f8] sm:$0xff]  ;;  %v292_v32 = vpack.c.bf16 %v244_v29, %v243_v28 }
  0x28   : > { %1677 = vmatprep.mubr.msk.bf16.mxu1 %vm325_vm0, %v299_v43  ;;  %v308_v33 = vpack.c.bf16 %v276_v31, %v275_v30 }
  0x2e   : > { %1646 = vmatmul.mubr.msk.bf16.gmra.mxu0 %vm325_vm0, %v284_v52 }
  0x2f   : > { %1678 = vmatmul.mubr.msk.bf16.gmra.mxu1 %vm325_vm0, %v300_v53  ;;  %1649 = vmatprep.mubr.msk.bf16.mxu0 %vm325_vm0, %v285_v54 }
  0x30   : > { %1681 = vmatprep.mubr.msk.bf16.mxu1 %vm325_vm0, %v301_v55 }
  0x36   : > { %1650 = vmatmul.mubr.msk.bf16.gmra.mxu0 %vm325_vm0, %v286_v0 }
  0x37   : > { %1682 = vmatmul.mubr.msk.bf16.gmra.mxu1 %vm325_vm0, %v302_v1  ;;  %1653 = vmatprep.mubr.msk.bf16.mxu0 %vm325_vm0, %v287_v2 }
  0x38   : > { %1685 = vmatprep.mubr.msk.bf16.mxu1 %vm325_vm0, %v303_v3 }
  0x3e   : > { %1654 = vmatmul.mubr.msk.bf16.gmra.mxu0 %vm325_vm0, %v288_v12 }
  0x3f   : > { %1686 = vmatmul.mubr.msk.bf16.gmra.mxu1 %vm325_vm0, %v304_v13  ;;  %1657 = vmatprep.mubr.msk.bf16.mxu0 %vm325_vm0, %v289_v14 }
  0x40   : > { %1689 = vmatprep.mubr.msk.bf16.mxu1 %vm325_vm0, %v305_v15 }
  0x46   : > { %1658 = vmatmul.mubr.msk.bf16.gmra.mxu0 %vm325_vm0, %v290_v24 }
  0x47   : > { %1690 = vmatmul.mubr.msk.bf16.gmra.mxu1 %vm325_vm0, %v306_v25  ;;  %1661 = vmatprep.mubr.msk.bf16.mxu0 %vm325_vm0, %v291_v26 }
  0x48   : > { %1693 = vmatprep.mubr.msk.bf16.mxu1 %vm325_vm0, %v307_v27 }
  0x4e   : > { %1662 = vmatmul.mubr.msk.bf16.gmra.mxu0 %vm325_vm0, %v292_v32 }
  0x4f   : > { %1694 = vmatmul.mubr.msk.bf16.gmra.mxu1 %vm325_vm0, %v308_v33 }
  0xd6   : > { %v1943_v34 = vpop.f32.mrf.mxu0 }
  0xd7   : > { %3011 = vst [vmem:[#allocation11_spill] sm:$0xff] %v1943_v34  ;;  %v1945_v35 = vpop.f32.mrf.mxu1 }
  0xd8   : > { %v1947_v36 = vpop.f32.mrf.mxu0 }
  0xd9   : > { %v1949_v37 = vpop.f32.mrf.mxu1 }
  0xda   : > { %3012 = vst [vmem:[#allocation12_spill] sm:$0xff] %v1949_v37  ;;  %v1951_v38 = vpop.f32.mrf.mxu0 }
  0xdb   : > { %3013 = vst [vmem:[#allocation13_spill] sm:$0xff] %v1951_v38  ;;  %v1953_v39 = vpop.f32.mrf.mxu1 }
  0xdc   : > { %v1955_v40 = vpop.f32.mrf.mxu0 }
  0xdd   : > { %3014 = vst [vmem:[#allocation14_spill] sm:$0xff] %v1955_v40  ;;  %v1957_v41 = vpop.f32.mrf.mxu1 }
  0xde   : > { %v1959_v42 = vpop.f32.mrf.mxu0 }
  0xdf   : > { %3015 = vst [vmem:[#allocation15_spill] sm:$0xff] %v1959_v42  ;;  %v1961_v43 = vpop.f32.mrf.mxu1 }
  0xe0   : > { %v1963_v44 = vpop.f32.mrf.mxu0 }
  0xe1   : > { %3016 = vst [vmem:[#allocation16_spill] sm:$0xff] %v1963_v44  ;;  %v1965_v45 = vpop.f32.mrf.mxu1 }
  0xe2   : > { %v1967_v46 = vpop.f32.mrf.mxu0 }
  0xe3   : > { %3017 = vst [vmem:[#allocation17_spill] sm:$0xff] %v1967_v46  ;;  %v1969_v47 = vpop.f32.mrf.mxu1 }
  0xe4   : > { %v1971_v48 = vpop.f32.mrf.mxu0 }
  0xe5   : > { %3018 = vst [vmem:[#allocation18_spill] sm:$0xff] %v1971_v48  ;;  %v1973_v49 = vpop.f32.mrf.mxu1 }
  0xe6   : > { %v1975_v50 = vpop.f32.mrf.mxu0 }
  0xe7   : > { %3019 = vst [vmem:[#allocation19_spill] sm:$0xff] %v1975_v50  ;;  %v1977_v51 = vpop.f32.mrf.mxu1 }
  0xe8   : > { %v1979_v52 = vpop.f32.mrf.mxu0 }
  0xe9   : > { %3020 = vst [vmem:[#allocation20_spill] sm:$0xff] %v1979_v52  ;;  %v1981_v53 = vpop.f32.mrf.mxu1 }
  0xea   : > { %v1983_v54 = vpop.f32.mrf.mxu0 }
  0xeb   : > { %3021 = vst [vmem:[#allocation21_spill] sm:$0xff] %v1983_v54  ;;  %v1985_v55 = vpop.f32.mrf.mxu1 }
  0xec   : > { %3022 = vst [vmem:[#allocation22_spill] sm:$0xff] %v1985_v55  ;;  %v1987_v56 = vpop.f32.mrf.mxu0 }
  0xed   : > { %3023 = vst [vmem:[#allocation23_spill] sm:$0xff] %v1987_v56  ;;  %v1989_v57 = vpop.f32.mrf.mxu1 }
  0xee   : > { %v1991_v58 = vpop.f32.mrf.mxu0 }
  0xef   : > { %3024 = vst [vmem:[#allocation24_spill] sm:$0xff] %v1991_v58  ;;  %v1993_v59 = vpop.f32.mrf.mxu1 }
  0xf0   : > { %3025 = vst [vmem:[#allocation25_spill] sm:$0xff] %v1993_v59  ;;  %v1995_v60 = vpop.f32.mrf.mxu0 }
  0xf1   : > { %3026 = vst [vmem:[#allocation26_spill] sm:$0xff] %v1995_v60  ;;  %v1997_v61 = vpop.f32.mrf.mxu1 }
  0xf2   : > { %3027 = vst [vmem:[#allocation27_spill] sm:$0xff] %v1997_v61  ;;  %v1999_v62 = vpop.f32.mrf.mxu0 }
  0xf3   : > { %3028 = vst [vmem:[#allocation28_spill] sm:$0xff] %v1999_v62  ;;  %v2001_v63 = vpop.f32.mrf.mxu1 }
  0xf4   : > { %3029 = vst [vmem:[#allocation29_spill] sm:$0xff] %v2001_v63  ;;  %v2003_v0 = vpop.f32.mrf.mxu0 }
  0xf5   : > { %3030 = vst [vmem:[#allocation30_spill] sm:$0xff] %v2003_v0  ;;  %v2005_v1 = vpop.f32.mrf.mxu1 }
  0xf6   : > { %3031 = vst [vmem:[#allocation31_spill] sm:$0xff] %v2005_v1  ;;  %v2007_v2 = vpop.f32.mrf.mxu0 }
  0xf7   : > { %3032 = vst [vmem:[#allocation32_spill] sm:$0xff] %v2007_v2  ;;  %v2009_v3 = vpop.f32.mrf.mxu1 }
  0xf8   : > { %3033 = vst [vmem:[#allocation33_spill] sm:$0xff] %v2009_v3  ;;  %v2011_v4 = vpop.f32.mrf.mxu0 }
  0xf9   : > { %3034 = vst [vmem:[#allocation34_spill] sm:$0xff] %v2011_v4  ;;  %v2013_v5 = vpop.f32.mrf.mxu1 }
  0xfa   : > { %3035 = vst [vmem:[#allocation35_spill] sm:$0xff] %v2013_v5  ;;  %v2015_v6 = vpop.f32.mrf.mxu0 }
  0xfb   : > { %3036 = vst [vmem:[#allocation36_spill] sm:$0xff] %v2015_v6  ;;  %v2017_v7 = vpop.f32.mrf.mxu1 }
  0xfc   : > { %3037 = vst [vmem:[#allocation37_spill] sm:$0xff] %v2017_v7  ;;  %v2019_v8 = vpop.f32.mrf.mxu0 }
  0xfd   : > { %3038 = vst [vmem:[#allocation38_spill] sm:$0xff] %v2019_v8  ;;  %v2021_v9 = vpop.f32.mrf.mxu1 }
  0xfe   : > { %3039 = vst [vmem:[#allocation39_spill] sm:$0xff] %v2021_v9  ;;  %v2023_v10 = vpop.f32.mrf.mxu0 }
  0xff   : > { %3040 = vst [vmem:[#allocation40_spill] sm:$0xff] %v2023_v10  ;;  %v2025_v11 = vpop.f32.mrf.mxu1 }
 0x100   : > { %3041 = vst [vmem:[#allocation41_spill] sm:$0xff] %v2025_v11  ;;  %v2027_v12 = vpop.f32.mrf.mxu0 }
 0x101   : > { %3042 = vst [vmem:[#allocation42_spill] sm:$0xff] %v2027_v12  ;;  %v2029_v13 = vpop.f32.mrf.mxu1 }
 0x102   : > { %3043 = vst [vmem:[#allocation43_spill] sm:$0xff] %v2029_v13  ;;  %v2031_v14 = vpop.f32.mrf.mxu0 }
 0x103   : > { %3044 = vst [vmem:[#allocation44_spill] sm:$0xff] %v2031_v14  ;;  %v2033_v15 = vpop.f32.mrf.mxu1 }
 0x104   : > { %3045 = vst [vmem:[#allocation45_spill] sm:$0xff] %v2033_v15  ;;  %v2035_v16 = vpop.f32.mrf.mxu0 }
 0x105   : > { %3046 = vst [vmem:[#allocation46_spill] sm:$0xff] %v2035_v16  ;;  %v2037_v17 = vpop.f32.mrf.mxu1 }
 0x106   : > { %3047 = vst [vmem:[#allocation47_spill] sm:$0xff] %v2037_v17  ;;  %v2039_v18 = vpop.f32.mrf.mxu0 }
 0x107   : > { %3048 = vst [vmem:[#allocation48_spill] sm:$0xff] %v2039_v18  ;;  %v2041_v19 = vpop.f32.mrf.mxu1 }
 0x108   : > { %3049 = vst [vmem:[#allocation49_spill] sm:$0xff] %v2041_v19  ;;  %v2043_v20 = vpop.f32.mrf.mxu0 }
 0x109   : > { %3050 = vst [vmem:[#allocation50_spill] sm:$0xff] %v2043_v20  ;;  %v2045_v21 = vpop.f32.mrf.mxu1 }
 0x10a   : > { %3051 = vst [vmem:[#allocation51_spill] sm:$0xff] %v2045_v21  ;;  %v2047_v22 = vpop.f32.mrf.mxu0 }
 0x10b   : > { %3052 = vst [vmem:[#allocation52_spill] sm:$0xff] %v2047_v22  ;;  %v2049_v23 = vpop.f32.mrf.mxu1 }
 0x10c   : > { %3053 = vst [vmem:[#allocation53_spill] sm:$0xff] %v2049_v23  ;;  %v2051_v24 = vpop.f32.mrf.mxu0 }
 0x10d   : > { %3054 = vst [vmem:[#allocation54_spill] sm:$0xff] %v2051_v24  ;;  %v2053_v25 = vpop.f32.mrf.mxu1 }
 0x10e   : > { %3055 = vst [vmem:[#allocation55_spill] sm:$0xff] %v2053_v25  ;;  %v2055_v26 = vpop.f32.mrf.mxu0 }
 0x10f   : > { %3056 = vst [vmem:[#allocation56_spill] sm:$0xff] %v2055_v26  ;;  %v2057_v27 = vpop.f32.mrf.mxu1 }
 0x110   : > { %3057 = vst [vmem:[#allocation57_spill] sm:$0xff] %v2057_v27  ;;  %v2059_v28 = vpop.f32.mrf.mxu0 }
 0x111   : > { %3058 = vst [vmem:[#allocation58_spill] sm:$0xff] %v2059_v28  ;;  %v2061_v29 = vpop.f32.mrf.mxu1 }
 0x112   : > { %3059 = vst [vmem:[#allocation59_spill] sm:$0xff] %v2061_v29  ;;  %v2063_v30 = vpop.f32.mrf.mxu0  ;;  %714 = sbr.rel (%p1585_p4) target bundleno = 420 (0x1a4), region = 40 }
 0x113   : > { %3060 = vst [vmem:[#allocation60_spill] sm:$0xff] %v2063_v30  ;;  %v2065_v31 = vpop.f32.mrf.mxu1 }
 0x114   : > { %3061 = vst [vmem:[#allocation61_spill] sm:$0xff] %v2065_v31  ;;  %v2067_v32 = vpop.f32.mrf.mxu0 }
 0x115   : > { %3062 = vst [vmem:[#allocation62_spill] sm:$0xff] %v2067_v32  ;;  %v2069_v33 = vpop.f32.mrf.mxu1 }
 0x116   : > { %3063 = vst [vmem:[#allocation63_spill] sm:$0xff] %v2069_v33 }
 0x117   : > { %v717_v23 = vadd.f32 %v1955_v40, %v1947_v36  ;;  %v1792_v19 = vmov 0.0  }
 0x118   : > { %715 = vst [vmem:[#allocation3] sm:$0xff] %v1792_v19  ;;  %716 = vst [vmem:[#allocation4] sm:$0xff] %v1792_v19 }
 0x119   : > { %v718_v27 = vadd.f32 %v1943_v34, %v717_v23 }
 0x11b   : > { %v719_v29 = vadd.f32 %v1951_v38, %v718_v27 }
 0x11d   : > { %v720_v25 = vadd.f32 %v719_v29, %v1963_v44 }
 0x11f   : > { %v721_v31 = vadd.f32 %v720_v25, %v1971_v48 }
 0x121   : > { %v722_v21 = vadd.f32 %v1959_v42, %v721_v31 }
 0x123   : > { %v723_v33 = vadd.f32 %v1967_v46, %v722_v21 }
 0x125   : > { %v724_v15 = vadd.f32 %v723_v33, %v1979_v52 }
 0x127   : > { %v725_v11 = vadd.f32 %v724_v15, %v1987_v56 }
 0x129   : > { %v726_v40 = vadd.f32 %v1975_v50, %v725_v11 }
 0x12b   : > { %v727_v19 = vadd.f32 %v1983_v54, %v726_v40 }
 0x12d   : > { %v728_v23 = vadd.f32 %v727_v19, %v1995_v60 }
 0x12f   : > { %v729_v27 = vadd.f32 %v728_v23, %v2003_v0 }
 0x131   : > { %v730_v29 = vadd.f32 %v1991_v58, %v729_v27 }
 0x133   : > { %v731_v25 = vadd.f32 %v1999_v62, %v730_v29 }
 0x135   : > { %v732_v31 = vadd.f32 %v731_v25, %v2011_v4 }
 0x137   : > { %v733_v21 = vadd.f32 %v732_v31, %v2019_v8 }
 0x139   : > { %v734_v33 = vadd.f32 %v2007_v2, %v733_v21 }
 0x13b   : > { %v735_v15 = vadd.f32 %v2015_v6, %v734_v33 }
 0x13d   : > { %v736_v11 = vadd.f32 %v735_v15, %v2027_v12 }
 0x13f   : > { %v737_v40 = vadd.f32 %v736_v11, %v2035_v16 }
 0x141   : > { %v738_v19 = vadd.f32 %v2023_v10, %v737_v40 }
 0x143   : > { %v739_v23 = vadd.f32 %v2031_v14, %v738_v19  ;;  %v3073_v14 = vld [vmem:[#allocation61_spill] sm:$0xff] }
 0x145   : > { %v740_v27 = vadd.f32 %v739_v23, %v2043_v20  ;;  %v3072_v20 = vld [vmem:[#allocation57_spill] sm:$0xff] }
 0x147   : > { %v741_v29 = vadd.f32 %v740_v27, %v2051_v24  ;;  %v3071_v24 = vld [vmem:[#allocation63_spill] sm:$0xff] }
 0x149   : > { %v742_v25 = vadd.f32 %v2039_v18, %v741_v29  ;;  %v3070_v18 = vld [vmem:[#allocation59_spill] sm:$0xff] }
 0x14b   : > { %v743_v31 = vadd.f32 %v2047_v22, %v742_v25  ;;  %v3069_v22 = vld [vmem:[#allocation53_spill] sm:$0xff] }
 0x14d   : > { %v744_v21 = vadd.f32 %v743_v31, %v2059_v28  ;;  %v3068_v28 = vld [vmem:[#allocation49_spill] sm:$0xff] }
 0x14f   : > { %v745_v33 = vadd.f32 %v744_v21, %v2067_v32  ;;  %v3067_v32 = vld [vmem:[#allocation55_spill] sm:$0xff] }
 0x151   : > { %v746_v15 = vadd.f32 %v2055_v26, %v745_v33  ;;  %v3066_v26 = vld [vmem:[#allocation51_spill] sm:$0xff] }
 0x153   : > { %v747_v11 = vadd.f32 %v2063_v30, %v746_v15  ;;  %v3065_v30 = vld [vmem:[#allocation45_spill] sm:$0xff] }
 0x155   : > { %v748_v40 = vadd.f32 %v747_v11, %v1949_v37  ;;  %v3064_v37 = vld [vmem:[#allocation41_spill] sm:$0xff] }
 0x157   : > { %v749_v19 = vadd.f32 %v748_v40, %v1957_v41 }
 0x159   : > { %v750_v23 = vadd.f32 %v1945_v35, %v749_v19 }
 0x15b   : > { %v751_v27 = vadd.f32 %v1953_v39, %v750_v23 }
 0x15d   : > { %v752_v29 = vadd.f32 %v751_v27, %v1965_v45 }
 0x15f   : > { %v753_v25 = vadd.f32 %v752_v29, %v1973_v49 }
 0x161   : > { %v754_v31 = vadd.f32 %v1961_v43, %v753_v25 }
 0x163   : > { %v755_v21 = vadd.f32 %v1969_v47, %v754_v31 }
 0x165   : > { %v756_v33 = vadd.f32 %v755_v21, %v1981_v53 }
 0x167   : > { %v757_v15 = vadd.f32 %v756_v33, %v1989_v57 }
 0x169   : > { %v758_v11 = vadd.f32 %v1977_v51, %v757_v15 }
 0x16b   : > { %v759_v40 = vadd.f32 %v1985_v55, %v758_v11 }
 0x16d   : > { %v760_v19 = vadd.f32 %v759_v40, %v1997_v61 }
 0x16f   : > { %v761_v23 = vadd.f32 %v760_v19, %v2005_v1 }
 0x171   : > { %v762_v27 = vadd.f32 %v1993_v59, %v761_v23 }
 0x173   : > { %v763_v29 = vadd.f32 %v2001_v63, %v762_v27 }
 0x175   : > { %v764_v25 = vadd.f32 %v763_v29, %v2013_v5 }
 0x177   : > { %v765_v31 = vadd.f32 %v764_v25, %v2021_v9 }
 0x179   : > { %v766_v21 = vadd.f32 %v2009_v3, %v765_v31 }
 0x17b   : > { %v767_v33 = vadd.f32 %v2017_v7, %v766_v21 }
 0x17d   : > { %v768_v15 = vadd.f32 %v767_v33, %v2029_v13 }
 0x17f   : > { %v769_v11 = vadd.f32 %v768_v15, %v2037_v17 }
 0x181   : > { %v770_v40 = vadd.f32 %v3064_v37, %v769_v11 }
 0x183   : > { %v771_v19 = vadd.f32 %v3065_v30, %v770_v40 }
 0x185   : > { %v772_v23 = vadd.f32 %v771_v19, %v3066_v26 }
 0x187   : > { %v773_v27 = vadd.f32 %v772_v23, %v3067_v32 }
 0x189   : > { %v774_v29 = vadd.f32 %v3068_v28, %v773_v27 }
 0x18b   : > { %v775_v25 = vadd.f32 %v3069_v22, %v774_v29 }
 0x18d   : > { %v776_v31 = vadd.f32 %v775_v25, %v3070_v18 }
 0x18f   : > { %v777_v21 = vadd.f32 %v776_v31, %v3071_v24 }
 0x191   : > { %v778_v33 = vadd.f32 %v3072_v20, %v777_v21 }
 0x193   : > { %v779_v15 = vadd.f32 %v3073_v14, %v778_v33 }
 0x195   : > { %v780_v10 = vrot.slane %v779_v15, 4 }
 0x197   : > { %v781_v37 = vadd.f32 %v780_v10, %v779_v15 }
 0x199   : > { %v782_v11 = vrot.slane %v781_v37, 2 }
 0x19b   : > { %v783_v30 = vadd.f32 %v782_v11, %v781_v37 }
 0x19d   : > { %v784_v40 = vrot.slane %v783_v30, 1 }
 0x19f   : > { %v785_v26 = vadd.f32 %v784_v40, %v783_v30 }
 0x1a1   : > { %v787_v19 = vmul.f32 0.001953125, %v785_v26 }
 0x1a3   : > { %788 = vst [vmem:[#allocation2] sm:$0x1] %v787_v19 }
 0x1a4 PF: > { %v861_v28 = vlaneseq  ;;  %s1587_s29 = sshll.u32 %s1831_s19, 9  ;;  %v3080_v34 = vld [vmem:[#allocation55_spill] sm:$0xff]  ;;  %v3081_v5 = vld [vmem:[#allocation49_spill] sm:$0xff]  ;;  %p1588_p5 = scmp.ne.s32.totalorder %s1831_s19, 1 }
 0x1a5   : > { %v2142_v24 = vstv %s1587_s29  ;;  %v3082_v13 = vld [vmem:[#allocation53_spill] sm:$0xff] }
 0x1a6   : > { %v2137_v22 = vshrl.u32 %v861_v28, 7  ;;  %v3083_v63 = vld [vmem:[#allocation59_spill] sm:$0xff]  ;;  %v3085_v1 = vld [vmem:[#allocation57_spill] sm:$0xff] }
 0x1a8   : > { %v895_v18 = vadd.s32 264, %v2137_v22  ;;  %v896_v20 = vadd.s32 272, %v2137_v22  ;;  %v897_v14 = vadd.s32 280, %v2137_v22  ;;  %v898_v10 = vadd.s32 288, %v2137_v22 }
 0x1a9   : > { %v899_v32 = vadd.s32 296, %v2137_v22  ;;  %v900_v23 = vadd.s32 304, %v2137_v22  ;;  %v901_v27 = vadd.s32 312, %v2137_v22  ;;  %v902_v29 = vadd.s32 320, %v2137_v22 }
 0x1aa   : > { %v903_v25 = vadd.s32 328, %v2137_v22  ;;  %v904_v31 = vadd.s32 336, %v2137_v22  ;;  %v905_v21 = vadd.s32 344, %v2137_v22  ;;  %v906_v33 = vadd.s32 352, %v2137_v22  ;;  %v3084_v7 = vld [vmem:[#allocation63_spill] sm:$0xff] }
 0x1ab   : > { %v907_v15 = vadd.s32 360, %v2137_v22  ;;  %v908_v37 = vadd.s32 368, %v2137_v22  ;;  %v909_v11 = vadd.s32 376, %v2137_v22  ;;  %v910_v30 = vadd.s32 384, %v2137_v22 }
 0x1ac   : > { %v911_v40 = vadd.s32 392, %v2137_v22  ;;  %v912_v26 = vadd.s32 400, %v2137_v22  ;;  %v913_v19 = vadd.s32 408, %v2137_v22  ;;  %v914_v28 = vadd.s32 416, %v2137_v22 }
 0x1ad   : > { %v915_v16 = vadd.s32 424, %v2137_v22  ;;  %v916_v12 = vadd.s32 432, %v2137_v22  ;;  %v917_v6 = vadd.s32 440, %v2137_v22  ;;  %v918_v2 = vadd.s32 448, %v2137_v22 }
 0x1ae   : > { %v919_v8 = vadd.s32 456, %v2137_v22  ;;  %v920_v4 = vadd.s32 464, %v2137_v22  ;;  %v921_v62 = vadd.s32 472, %v2137_v22  ;;  %v922_v58 = vadd.s32 480, %v2137_v22 }
 0x1af   : > { %v923_v0 = vadd.s32 488, %v2137_v22  ;;  %v924_v60 = vadd.s32 496, %v2137_v22  ;;  %v925_v54 = vadd.s32 504, %v2137_v22  ;;  %v2173_v50 = vadd.s32 %v2142_v24, %v895_v18 }
 0x1b0   : > { %v2176_v56 = vadd.s32 %v2142_v24, %v896_v20  ;;  %v2179_v52 = vadd.s32 %v2142_v24, %v897_v14  ;;  %v2182_v46 = vadd.s32 %v2142_v24, %v898_v10  ;;  %v2185_v42 = vadd.s32 %v2142_v24, %v899_v32 }
 0x1b1   : > { %v2188_v48 = vadd.s32 %v2142_v24, %v900_v23  ;;  %v2191_v44 = vadd.s32 %v2142_v24, %v901_v27  ;;  %v2194_v18 = vadd.s32 %v2142_v24, %v902_v29  ;;  %v2197_v20 = vadd.s32 %v2142_v24, %v903_v25 }
 0x1b2   : > { %v2200_v14 = vadd.s32 %v2142_v24, %v904_v31  ;;  %v2203_v10 = vadd.s32 %v2142_v24, %v905_v21  ;;  %v2206_v32 = vadd.s32 %v2142_v24, %v906_v33  ;;  %v2209_v23 = vadd.s32 %v2142_v24, %v907_v15 }
 0x1b3   : > { %v2212_v27 = vadd.s32 %v2142_v24, %v908_v37  ;;  %v2215_v29 = vadd.s32 %v2142_v24, %v909_v11  ;;  %v2218_v25 = vadd.s32 %v2142_v24, %v910_v30  ;;  %v2221_v31 = vadd.s32 %v2142_v24, %v911_v40 }
 0x1b4   : > { %v2224_v21 = vadd.s32 %v2142_v24, %v912_v26  ;;  %v2227_v33 = vadd.s32 %v2142_v24, %v913_v19  ;;  %v2230_v15 = vadd.s32 %v2142_v24, %v914_v28  ;;  %v2233_v37 = vadd.s32 %v2142_v24, %v915_v16 }
 0x1b5   : > { %v2236_v11 = vadd.s32 %v2142_v24, %v916_v12  ;;  %v2239_v30 = vadd.s32 %v2142_v24, %v917_v6  ;;  %v2242_v40 = vadd.s32 %v2142_v24, %v918_v2  ;;  %v2245_v26 = vadd.s32 %v2142_v24, %v919_v8  ;;  %v2265_v8 = vld [vmem:[#allocation2] ss:$0 sm:$0xff] }
 0x1b6   : > { %v2248_v19 = vadd.s32 %v2142_v24, %v920_v4  ;;  %v2251_v28 = vadd.s32 %v2142_v24, %v921_v62  ;;  %v2254_v16 = vadd.s32 %v2142_v24, %v922_v58  ;;  %v2257_v12 = vadd.s32 %v2142_v24, %v923_v0  ;;  %v3076_v62 = vld [vmem:[#allocation14_spill] sm:$0xff] }
 0x1b7   : > { %v2260_v6 = vadd.s32 %v2142_v24, %v924_v60  ;;  %v2263_v2 = vadd.s32 %v2142_v24, %v925_v54  ;;  %v863_v60 = vadd.s32 8, %v2137_v22  ;;  %v864_v4 = vadd.s32 16, %v2137_v22 }
 0x1b8   : > { %3074 = vst [vmem:[#allocation64_spill] sm:$0xff] %v2251_v28  ;;  %v865_v9 = vadd.s32 24, %v2137_v22  ;;  %v866_v28 = vadd.s32 32, %v2137_v22  ;;  %v867_v0 = vadd.s32 40, %v2137_v22  ;;  %v927_v38 = vadd.s32 %v2142_v24, %v2137_v22 }
 0x1b9   : > { %3075 = vst [vmem:[#allocation65_spill] sm:$0xff] %v2263_v2  ;;  %v928_v17 = vadd.s32 %v2142_v24, %v863_v60  ;;  %v3086_v60 = vld [vmem:[#allocation61_spill] sm:$0xff]  ;;  %v2346_v54 = vadd.s32 48, %v2137_v22  ;;  %v2349_v2 = vadd.s32 56, %v2137_v22  ;;  %v2352_v3 = vadd.s32 %v2142_v24, %v864_v4 }
 0x1ba   : > { %v2355_v59 = vadd.s32 %v2142_v24, %v865_v9  ;;  %v2358_v58 = vadd.s32 %v2142_v24, %v866_v28  ;;  %v2361_v61 = vadd.s32 %v2142_v24, %v867_v0  ;;  %vm991_vm1 = vcmp.lt.s32.totalorder %v927_v38, 1000 }
 0x1bb   : > { %3087 = vst [vmem:[#allocation14_spill] sm:$0xff] %v2349_v2  ;;  %vm992_vm2 = vcmp.lt.s32.totalorder %v928_v17, 1000  ;;  %vm1024_vm3 = vcmp.lt.s32.totalorder %v2173_v50, 1000  ;;  %vm1025_vm4 = vcmp.lt.s32.totalorder %v2176_v56, 1000  ;;  %vm1026_vm5 = vcmp.lt.s32.totalorder %v2179_v52, 1000  ;;  %v3111_v17 = vld [vmem:[#allocation22_spill] sm:$0xff] }
 0x1bc   : > { %3088 = vst [vmem:[#allocation55_spill] sm:$0xff] %v2355_v59  ;;  %3089 = vst [vmem:[#allocation49_spill] sm:$0xff] %v2358_v58  ;;  %vm1027_vm6 = vcmp.lt.s32.totalorder %v2182_v46, 1000  ;;  %vm1046_vm0 = vcmp.lt.s32.totalorder %v2239_v30, 1000  ;;  %vm1047_vm7 = vcmp.lt.s32.totalorder %v2242_v40, 1000  ;;  %vm1048_vm8 = vcmp.lt.s32.totalorder %v2245_v26, 1000 }
 0x1bd   : > { %3090 = vst [vmem:[#allocation53_spill] sm:$0xff] %v2361_v61  ;;  %vm1049_vm9 = vcmp.lt.s32.totalorder %v2248_v19, 1000  ;;  %vm1051_vm11 = vcmp.lt.s32.totalorder %v2254_v16, 1000  ;;  %vm1052_vm12 = vcmp.lt.s32.totalorder %v2257_v12, 1000  ;;  %vm994_vm13 = vcmp.lt.s32.totalorder %v2355_v59, 1000  ;;  %v3160_v12 = vld [vmem:[#allocation16_spill] sm:$0xff] }
 0x1be   : > { %vm1053_vm14 = vcmp.lt.s32.totalorder %v2260_v6, 1000  ;;  %v3093_v4 = vsub.f32 %v1947_v36, %v2265_v8  ;;  %v3094_v55 = vsub.f32 %v3076_v62, %v2265_v8  ;;  %v3095_v2 = vsub.f32 %v1957_v41, %v2265_v8  ;;  %v3117_v62 = vld [vmem:[#allocation31_spill] sm:$0xff] }
 0x1bf   : > { %v3091_v9 = vld [vmem:[#allocation64_spill] sm:$0xff]  ;;  %v3096_v58 = vsub.f32 %v1945_v35, %v2265_v8  ;;  %v3097_v38 = vsub.f32 %v1953_v39, %v2265_v8  ;;  %v3098_v41 = vsub.f32 %v1965_v45, %v2265_v8  ;;  %v3099_v35 = vsub.f32 %v1973_v49, %v2265_v8 }
 0x1c0   : > { %vm1050_vm10 = vcmp.lt.s32.totalorder %v3091_v9, 1000  ;;  %v3092_v28 = vld [vmem:[#allocation65_spill] sm:$0xff]  ;;  %v2400_v0 = vsel %vm991_vm1, %v3093_v4, 0.0  ;;  %v2406_v61 = vsel %vm992_vm2, %v3094_v55, 0.0  ;;  %v2413_v59 = vsel %vm1024_vm3, %v3095_v2, 0.0  ;;  %v3114_v2 = vld [vmem:[#allocation27_spill] sm:$0xff] }
 0x1c1   : > { %vm1054_vm15 = vcmp.lt.s32.totalorder %v3092_v28, 1000  ;;  %v2420_v36 = vsel %vm1025_vm4, %v3096_v58, 0.0  ;;  %v2427_v55 = vsel %vm1026_vm5, %v3097_v38, 0.0  ;;  %v2434_v50 = vsel %vm1027_vm6, %v3098_v41, 0.0  ;;  %v3120_v58 = vld [vmem:[#allocation25_spill] sm:$0xff] }
 0x1c2   : > { %vm3100_vm1 = vcmp.lt.s32.totalorder %v2185_v42, 1000  ;;  %v3101_v39 = vsub.f32 %v1961_v43, %v2265_v8  ;;  %vm3102_vm2 = vcmp.lt.s32.totalorder %v2188_v48, 1000  ;;  %v3103_v45 = vsub.f32 %v1969_v47, %v2265_v8  ;;  %v3123_v38 = vld [vmem:[#allocation29_spill] sm:$0xff] }
 0x1c3   : > { %v2441_v56 = vsel %vm3100_vm1, %v3099_v35, 0.0  ;;  %vm3104_vm3 = vcmp.lt.s32.totalorder %v2191_v44, 1000  ;;  %v3105_v49 = vsub.f32 %v1981_v53, %v2265_v8  ;;  %vm3106_vm4 = vcmp.lt.s32.totalorder %v2194_v18, 1000  ;;  %v3126_v35 = vld [vmem:[#allocation35_spill] sm:$0xff]  ;;  %v3164_v28 = vld [vmem:[#allocation49_spill] sm:$0xff] }
 0x1c4   : > { %v2448_v52 = vsel %vm3102_vm2, %v3101_v39, 0.0  ;;  %v2455_v46 = vsel %vm3104_vm3, %v3103_v45, 0.0  ;;  %v3107_v43 = vsub.f32 %v1989_v57, %v2265_v8  ;;  %vm3108_vm5 = vcmp.lt.s32.totalorder %v2197_v20, 1000  ;;  %v3129_v45 = vld [vmem:[#allocation39_spill] sm:$0xff] }
 0x1c5   : > { %v2462_v42 = vsel %vm3106_vm4, %v3105_v49, 0.0  ;;  %v3109_v47 = vsub.f32 %v1977_v51, %v2265_v8  ;;  %vm3110_vm6 = vcmp.lt.s32.totalorder %v2200_v14, 1000  ;;  %v3112_v53 = vsub.f32 %v3111_v17, %v2265_v8  ;;  %v3135_v17 = vld [vmem:[#allocation37_spill] sm:$0xff] }
 0x1c6   : > { %v2469_v48 = vsel %vm3108_vm5, %v3107_v43, 0.0  ;;  %vm3113_vm1 = vcmp.lt.s32.totalorder %v2203_v10, 1000  ;;  %v3115_v57 = vsub.f32 %v3114_v2, %v2265_v8  ;;  %vm3116_vm2 = vcmp.lt.s32.totalorder %v2206_v32, 1000  ;;  %v3132_v43 = vld [vmem:[#allocation33_spill] sm:$0xff]  ;;  %v3138_v2 = vld [vmem:[#allocation43_spill] sm:$0xff] }
 0x1c7   : > { %v2476_v44 = vsel %vm3110_vm6, %v3109_v47, 0.0  ;;  %v2483_v18 = vsel %vm3113_vm1, %v3112_v53, 0.0  ;;  %v3118_v51 = vsub.f32 %v3117_v62, %v2265_v8  ;;  %vm3119_vm3 = vcmp.lt.s32.totalorder %v2209_v23, 1000  ;;  %v3141_v62 = vld [vmem:[#allocation47_spill] sm:$0xff] }
 0x1c8   : > { %v2490_v20 = vsel %vm3116_vm2, %v3115_v57, 0.0  ;;  %v3121_v4 = vsub.f32 %v3120_v58, %v2265_v8  ;;  %vm3122_vm4 = vcmp.lt.s32.totalorder %v2212_v27, 1000  ;;  %v3124_v41 = vsub.f32 %v3123_v38, %v2265_v8  ;;  %v3144_v58 = vld [vmem:[#allocation41_spill] sm:$0xff] }
 0x1c9   : > { %v2497_v14 = vsel %vm3119_vm3, %v3118_v51, 0.0  ;;  %vm3125_vm5 = vcmp.lt.s32.totalorder %v2215_v29, 1000  ;;  %v3127_v39 = vsub.f32 %v3126_v35, %v2265_v8  ;;  %vm3128_vm6 = vcmp.lt.s32.totalorder %v2218_v25, 1000  ;;  %v3147_v38 = vld [vmem:[#allocation45_spill] sm:$0xff]  ;;  %v3149_v35 = vld [vmem:[#allocation51_spill] sm:$0xff] }
 0x1ca   : > { %v2504_v10 = vsel %vm3122_vm4, %v3121_v4, 0.0  ;;  %v2511_v32 = vsel %vm3125_vm5, %v3124_v41, 0.0  ;;  %v3130_v49 = vsub.f32 %v3129_v45, %v2265_v8  ;;  %vm3131_vm1 = vcmp.lt.s32.totalorder %v2221_v31, 1000 }
 0x1cb   : > { %v2518_v23 = vsel %vm3128_vm6, %v3127_v39, 0.0  ;;  %v3133_v47 = vsub.f32 %v3132_v43, %v2265_v8  ;;  %vm3134_vm2 = vcmp.lt.s32.totalorder %v2224_v21, 1000  ;;  %v3136_v53 = vsub.f32 %v3135_v17, %v2265_v8  ;;  %v3161_v17 = vld [vmem:[#allocation11_spill] sm:$0xff] }
 0x1cc   : > { %v2525_v27 = vsel %vm3131_vm1, %v3130_v49, 0.0  ;;  %vm3137_vm3 = vcmp.lt.s32.totalorder %v2227_v33, 1000  ;;  %v3139_v57 = vsub.f32 %v3138_v2, %v2265_v8  ;;  %vm3140_vm4 = vcmp.lt.s32.totalorder %v2230_v15, 1000 }
 0x1cd   : > { %v2532_v29 = vsel %vm3134_vm2, %v3133_v47, 0.0  ;;  %v2539_v25 = vsel %vm3137_vm3, %v3136_v53, 0.0  ;;  %v3142_v51 = vsub.f32 %v3141_v62, %v2265_v8  ;;  %vm3143_vm5 = vcmp.lt.s32.totalorder %v2233_v37, 1000 }
 0x1ce   : > { %v2546_v31 = vsel %vm3140_vm4, %v3139_v57, 0.0  ;;  %v3145_v4 = vsub.f32 %v3144_v58, %v2265_v8  ;;  %vm3146_vm6 = vcmp.lt.s32.totalorder %v2236_v11, 1000  ;;  %v3148_v41 = vsub.f32 %v3147_v38, %v2265_v8  ;;  %v3165_v57 = vld [vmem:[#allocation18_spill] sm:$0xff] }
 0x1cf   : > { %v2553_v21 = vsel %vm3143_vm5, %v3142_v51, 0.0  ;;  %v3150_v39 = vsub.f32 %v3149_v35, %v2265_v8  ;;  %v3151_v45 = vsub.f32 %v3080_v34, %v2265_v8  ;;  %v3152_v49 = vsub.f32 %v3081_v5, %v2265_v8  ;;  %v3166_v51 = vld [vmem:[#allocation13_spill] sm:$0xff] }
 0x1d0   : > { %v2560_v33 = vsel %vm3146_vm6, %v3145_v4, 0.0  ;;  %v2567_v15 = vsel %vm1046_vm0, %v3148_v41, 0.0  ;;  %v3153_v43 = vsub.f32 %v3082_v13, %v2265_v8  ;;  %v3154_v34 = vsub.f32 %v3083_v63, %v2265_v8  ;;  %v3169_v41 = vld [vmem:[#allocation14_spill] sm:$0xff] }
 0x1d1   : > { %v2574_v37 = vsel %vm1047_vm7, %v3150_v39, 0.0  ;;  %v2581_v11 = vsel %vm1048_vm8, %v3151_v45, 0.0  ;;  %v2588_v30 = vsel %vm1049_vm9, %v3152_v49, 0.0  ;;  %v3155_v5 = vsub.f32 %v3084_v7, %v2265_v8  ;;  %v3170_v39 = vld [vmem:[#allocation53_spill] sm:$0xff]  ;;  %v3171_v45 = vld [vmem:[#allocation15_spill] sm:$0xff] }
 0x1d2   : > { %v2595_v40 = vsel %vm1050_vm10, %v3153_v43, 0.0  ;;  %v2602_v26 = vsel %vm1051_vm11, %v3154_v34, 0.0  ;;  %v3156_v13 = vsub.f32 %v3085_v1, %v2265_v8  ;;  %v3158_v63 = vsub.f32 %v3086_v60, %v2265_v8 }
 0x1d3   : > { %v2609_v19 = vsel %vm1052_vm12, %v3155_v5, 0.0  ;;  %v1248_v7 = vadd.f32 %v2406_v61, %v2400_v0  ;;  %v800_v47 = vsub.f32 %v3160_v12, %v2265_v8  ;;  %v3162_v1 = vsub.f32 %v3161_v17, %v2265_v8 }
 0x1d4   : > { %v2616_v9 = vsel %vm1053_vm14, %v3156_v13, 0.0  ;;  %v2623_v16 = vsel %vm1054_vm15, %v3158_v63, 0.0  ;;  %vm3163_vm7 = vcmp.lt.s32.totalorder %v2352_v3, 1000  ;;  %v870_v53 = vadd.s32 64, %v2137_v22  ;;  %v3172_v63 = vld [vmem:[#allocation17_spill] sm:$0xff] }
 0x1d5   : > { %3157 = vst [vmem:[#allocation59_spill] sm:$0xff] %v2616_v9  ;;  %3159 = vst [vmem:[#allocation63_spill] sm:$0xff] %v2623_v16  ;;  %v1185_v6 = vsel %vm3163_vm7, %v3162_v1, 0.0  ;;  %v933_v60 = vadd.s32 %v2142_v24, %v2346_v54  ;;  %vm995_vm8 = vcmp.lt.s32.totalorder %v3164_v28, 1000  ;;  %v801_v62 = vsub.f32 %v3165_v57, %v2265_v8 }
 0x1d6   : > { %v1249_v2 = vadd.f32 %v1248_v7, %v1185_v6  ;;  %v3167_v58 = vsub.f32 %v3166_v51, %v2265_v8  ;;  %v871_v3 = vadd.s32 72, %v2137_v22  ;;  %v934_v35 = vadd.s32 %v2142_v24, %v3169_v41 }
 0x1d7   : > { %vm996_vm9 = vcmp.lt.s32.totalorder %v3170_v39, 1000  ;;  %v802_v49 = vsub.f32 %v3171_v45, %v2265_v8  ;;  %v1187_v43 = vsel %vm995_vm8, %v800_v47, 0.0  ;;  %v872_v34 = vadd.s32 80, %v2137_v22  ;;  %v3175_v39 = vld [vmem:[#allocation19_spill] sm:$0xff] }
 0x1d8   : > { %v1186_v38 = vsel %vm994_vm13, %v3167_v58, 0.0  ;;  %v935_v5 = vadd.s32 %v2142_v24, %v870_v53  ;;  %vm997_vm10 = vcmp.lt.s32.totalorder %v933_v60, 1000  ;;  %v803_v7 = vsub.f32 %v3172_v63, %v2265_v8  ;;  %v3174_v58 = vld [vmem:[#allocation23_spill] sm:$0xff] }
 0x1d9   : > { %v1250_v54 = vadd.f32 %v1249_v2, %v1186_v38  ;;  %v1188_v12 = vsel %vm996_vm9, %v801_v62, 0.0  ;;  %v873_v17 = vadd.s32 88, %v2137_v22  ;;  %v936_v1 = vadd.s32 %v2142_v24, %v871_v3  ;;  %v3173_v2 = vld [vmem:[#allocation20_spill] sm:$0xff] }
 0x1da   : > { %vm998_vm11 = vcmp.lt.s32.totalorder %v934_v35, 1000  ;;  %v804_v57 = vsub.f32 %v3173_v2, %v2265_v8  ;;  %v1189_v47 = vsel %vm997_vm10, %v802_v49, 0.0  ;;  %v874_v51 = vadd.s32 96, %v2137_v22 }
 0x1db   : > { %v1251_v13 = vadd.f32 %v1250_v54, %v1187_v43  ;;  %v937_v53 = vadd.s32 %v2142_v24, %v872_v34  ;;  %vm999_vm12 = vcmp.lt.s32.totalorder %v935_v5, 1000  ;;  %v805_v4 = vsub.f32 %v3174_v58, %v2265_v8 }
 0x1dc   : > { %v1190_v62 = vsel %vm998_vm11, %v803_v7, 0.0  ;;  %v875_v41 = vadd.s32 104, %v2137_v22  ;;  %v938_v3 = vadd.s32 %v2142_v24, %v873_v17  ;;  %vm1000_vm13 = vcmp.lt.s32.totalorder %v936_v1, 1000 }
 0x1dd   : > { %v1252_v28 = vadd.f32 %v1251_v13, %v1188_v12  ;;  %v806_v54 = vsub.f32 %v3175_v39, %v2265_v8  ;;  %v1191_v45 = vsel %vm999_vm12, %v804_v57, 0.0  ;;  %v876_v49 = vadd.s32 112, %v2137_v22  ;;  %v3176_v13 = vld [vmem:[#allocation21_spill] sm:$0xff] }
 0x1de   : > { %v939_v34 = vadd.s32 %v2142_v24, %v874_v51  ;;  %vm1001_vm14 = vcmp.lt.s32.totalorder %v937_v53, 1000  ;;  %v807_v63 = vsub.f32 %v3176_v13, %v2265_v8  ;;  %v2671_v7 = vsel %vm1000_vm13, %v805_v4, 0.0  ;;  %v3177_v51 = vld [vmem:[#allocation26_spill] sm:$0xff] }
 0x1df   : > { %v1253_v60 = vadd.f32 %v1252_v28, %v1189_v47  ;;  %v1314_v17 = vmul.f32 %v2400_v0, %v2400_v0  ;;  %v1315_v1 = vmul.f32 %v2406_v61, %v2406_v61  ;;  %v877_v28 = vadd.s32 120, %v2137_v22 }
 0x1e0   : > { %v940_v2 = vadd.s32 %v2142_v24, %v875_v41  ;;  %vm1002_vm15 = vcmp.lt.s32.totalorder %v938_v3, 1000  ;;  %v808_v53 = vsub.f32 %v3177_v51, %v2265_v8  ;;  %v1316_v58 = vmul.f32 %v1185_v6, %v1185_v6  ;;  %v3179_v51 = vld [vmem:[#allocation24_spill] sm:$0xff] }
 0x1e1   : > { %v1254_v35 = vadd.f32 %v1253_v60, %v1190_v62  ;;  %v2682_v60 = vsel %vm1001_vm14, %v806_v54, 0.0  ;;  %v878_v4 = vadd.s32 128, %v2137_v22  ;;  %v941_v0 = vadd.s32 %v2142_v24, %v876_v49 }
 0x1e2   : > { %vm1003_vm0 = vcmp.lt.s32.totalorder %v939_v34, 1000  ;;  %v2689_v41 = vsel %vm1002_vm15, %v807_v63, 0.0  ;;  %v1317_v3 = vmul.f32 %v1186_v38, %v1186_v38  ;;  %v879_v13 = vadd.s32 136, %v2137_v22 }
 0x1e3   : > { %v1255_v5 = vadd.f32 %v1254_v35, %v1191_v45  ;;  %v3178_v35 = vld [vmem:[#allocation30_spill] sm:$0xff]  ;;  %v942_v54 = vadd.s32 %v2142_v24, %v877_v28  ;;  %vm1004_vm1 = vcmp.lt.s32.totalorder %v940_v2, 1000  ;;  %v810_v49 = vsub.f32 %v3179_v51, %v2265_v8 }
 0x1e4   : > { %v809_v39 = vsub.f32 %v3178_v35, %v2265_v8  ;;  %v2696_v34 = vsel %vm1003_vm0, %v808_v53, 0.0  ;;  %v880_v35 = vadd.s32 144, %v2137_v22  ;;  %v943_v63 = vadd.s32 %v2142_v24, %v878_v4 }
 0x1e5   : > { %v1256_v57 = vadd.f32 %v1255_v5, %v2671_v7  ;;  %v1378_v5 = vadd.f32 %v1315_v1, %v1314_v17  ;;  %vm1005_vm2 = vcmp.lt.s32.totalorder %v941_v0, 1000  ;;  %v3180_v17 = vld [vmem:[#allocation28_spill] sm:$0xff]  ;;  %v1319_v2 = vmul.f32 %v1188_v12, %v1188_v12  ;;  %v3182_v12 = vld [vmem:[#allocation38_spill] sm:$0xff] }
 0x1e6   : > { %v811_v1 = vsub.f32 %v3180_v17, %v2265_v8  ;;  %v2703_v28 = vsel %vm1004_vm1, %v809_v39, 0.0  ;;  %v881_v51 = vadd.s32 152, %v2137_v22  ;;  %v944_v53 = vadd.s32 %v2142_v24, %v879_v13 }
 0x1e7   : > { %v1257_v61 = vadd.f32 %v1256_v57, %v2682_v60  ;;  %v1318_v57 = vmul.f32 %v1187_v43, %v1187_v43  ;;  %v1379_v16 = vadd.f32 %v1378_v5, %v1316_v58  ;;  %vm1006_vm3 = vcmp.lt.s32.totalorder %v942_v54, 1000  ;;  %v3181_v58 = vld [vmem:[#allocation34_spill] sm:$0xff] }
 0x1e8   : > { %v812_v4 = vsub.f32 %v3181_v58, %v2265_v8  ;;  %v2710_v0 = vsel %vm1005_vm2, %v810_v49, 0.0  ;;  %v1320_v5 = vmul.f32 %v1189_v47, %v1189_v47  ;;  %v882_v17 = vadd.s32 160, %v2137_v22 }
 0x1e9   : > { %v1258_v6 = vadd.f32 %v1257_v61, %v2689_v41  ;;  %v1380_v61 = vadd.f32 %v1379_v16, %v1317_v3  ;;  %v945_v39 = vadd.s32 %v2142_v24, %v880_v35  ;;  %vm1007_vm4 = vcmp.lt.s32.totalorder %v943_v63, 1000 }
 0x1ea   : > { %v813_v3 = vsub.f32 %v3182_v12, %v2265_v8  ;;  %v2717_v13 = vsel %vm1006_vm3, %v811_v1, 0.0  ;;  %v1321_v54 = vmul.f32 %v1190_v62, %v1190_v62  ;;  %v883_v58 = vadd.s32 168, %v2137_v22 }
 0x1eb   : > { %v1259_v38 = vadd.f32 %v1258_v6, %v2696_v34  ;;  %v1381_v6 = vadd.f32 %v1380_v61, %v1318_v57  ;;  %v946_v49 = vadd.s32 %v2142_v24, %v881_v51  ;;  %vm1008_vm5 = vcmp.lt.s32.totalorder %v944_v53, 1000  ;;  %v3183_v57 = vld [vmem:[#allocation32_spill] sm:$0xff] }
 0x1ec   : > { %v814_v35 = vsub.f32 %v3183_v57, %v2265_v8  ;;  %v2724_v63 = vsel %vm1007_vm4, %v812_v4, 0.0  ;;  %v1322_v61 = vmul.f32 %v1191_v45, %v1191_v45  ;;  %v884_v12 = vadd.s32 176, %v2137_v22 }
 0x1ed   : > { %v1260_v43 = vadd.f32 %v1259_v38, %v2703_v28  ;;  %v1382_v38 = vadd.f32 %v1381_v6, %v1319_v2  ;;  %v947_v1 = vadd.s32 %v2142_v24, %v882_v17  ;;  %vm1009_vm6 = vcmp.lt.s32.totalorder %v945_v39, 1000  ;;  %v3184_v2 = vld [vmem:[#allocation36_spill] sm:$0xff]  ;;  %v3185_v17 = vld [vmem:[#allocation42_spill] sm:$0xff] }
 0x1ee   : > { %v815_v51 = vsub.f32 %v3184_v2, %v2265_v8  ;;  %v2731_v53 = vsel %vm1008_vm5, %v813_v3, 0.0  ;;  %v1323_v6 = vmul.f32 %v2671_v7, %v2671_v7  ;;  %v885_v4 = vadd.s32 184, %v2137_v22 }
 0x1ef   : > { %v1261_v16 = vadd.f32 %v1260_v43, %v2710_v0  ;;  %v1383_v43 = vadd.f32 %v1382_v38, %v1320_v5  ;;  %v948_v45 = vadd.s32 %v2142_v24, %v883_v58  ;;  %vm1010_vm7 = vcmp.lt.s32.totalorder %v946_v49, 1000  ;;  %v3186_v58 = vld [vmem:[#allocation46_spill] sm:$0xff] }
 0x1f0   : > { %v816_v39 = vsub.f32 %v3185_v17, %v2265_v8  ;;  %v2740_v38 = vsel %vm1009_vm6, %v814_v35, 0.0  ;;  %v1324_v3 = vmul.f32 %v2682_v60, %v2682_v60  ;;  %v886_v57 = vadd.s32 192, %v2137_v22 }
 0x1f1   : > { %v1262_v47 = vadd.f32 %v1261_v16, %v2717_v13  ;;  %v1384_v16 = vadd.f32 %v1383_v43, %v1321_v54  ;;  %v949_v7 = vadd.s32 %v2142_v24, %v884_v12  ;;  %vm1011_vm8 = vcmp.lt.s32.totalorder %v947_v1, 1000  ;;  %v3187_v12 = vld [vmem:[#allocation40_spill] sm:$0xff] }
 0x1f2   : > { %v817_v49 = vsub.f32 %v3186_v58, %v2265_v8  ;;  %v2749_v43 = vsel %vm1010_vm7, %v815_v51, 0.0  ;;  %v1325_v35 = vmul.f32 %v2689_v41, %v2689_v41  ;;  %v887_v2 = vadd.s32 200, %v2137_v22 }
 0x1f3   : > { %v1263_v62 = vadd.f32 %v1262_v47, %v2724_v63  ;;  %v1385_v47 = vadd.f32 %v1384_v16, %v1322_v61  ;;  %v950_v60 = vadd.s32 %v2142_v24, %v885_v4  ;;  %vm1012_vm9 = vcmp.lt.s32.totalorder %v948_v45, 1000  ;;  %v3188_v4 = vld [vmem:[#allocation44_spill] sm:$0xff] }
 0x1f4   : > { %v818_v1 = vsub.f32 %v3187_v12, %v2265_v8  ;;  %v2758_v16 = vsel %vm1011_vm8, %v816_v39, 0.0  ;;  %v1326_v51 = vmul.f32 %v2696_v34, %v2696_v34  ;;  %v888_v17 = vadd.s32 208, %v2137_v22 }
 0x1f5   : > { %v1264_v5 = vadd.f32 %v1263_v62, %v2731_v53  ;;  %v1386_v62 = vadd.f32 %v1385_v47, %v1323_v6  ;;  %v951_v41 = vadd.s32 %v2142_v24, %v886_v57  ;;  %vm1013_vm10 = vcmp.lt.s32.totalorder %v949_v7, 1000  ;;  %v3189_v57 = vld [vmem:[#allocation50_spill] sm:$0xff] }
 0x1f6   : > { %v819_v45 = vsub.f32 %v3188_v4, %v2265_v8  ;;  %v2767_v47 = vsel %vm1012_vm9, %v817_v49, 0.0  ;;  %v1327_v39 = vmul.f32 %v2703_v28, %v2703_v28  ;;  %v889_v58 = vadd.s32 216, %v2137_v22 }
 0x1f7   : > { %v1265_v54 = vadd.f32 %v1264_v5, %v2740_v38  ;;  %v1387_v5 = vadd.f32 %v1386_v62, %v1324_v3  ;;  %v952_v34 = vadd.s32 %v2142_v24, %v887_v2  ;;  %vm1014_vm11 = vcmp.lt.s32.totalorder %v950_v60, 1000 }
 0x1f8   : > { %v820_v7 = vsub.f32 %v3189_v57, %v2265_v8  ;;  %v1205_v62 = vsel %vm1013_vm10, %v818_v1, 0.0  ;;  %v890_v12 = vadd.s32 224, %v2137_v22  ;;  %v953_v28 = vadd.s32 %v2142_v24, %v888_v17 }
 0x1f9   : > { %v1266_v61 = vadd.f32 %v1265_v54, %v2749_v43  ;;  %v1388_v54 = vadd.f32 %v1387_v5, %v1325_v35  ;;  %vm1015_vm12 = vcmp.lt.s32.totalorder %v951_v41, 1000  ;;  %v3190_v5 = vld [vmem:[#allocation54_spill] sm:$0xff]  ;;  %v1206_v60 = vsel %vm1014_vm11, %v819_v45, 0.0 }
 0x1fa   : > { %v821_v2 = vsub.f32 %v3190_v5, %v2265_v8  ;;  %v891_v1 = vadd.s32 232, %v2137_v22  ;;  %v954_v57 = vadd.s32 %v2142_v24, %v889_v58  ;;  %vm1016_vm13 = vcmp.lt.s32.totalorder %v952_v34, 1000 }
 0x1fb   : > { %v1267_v6 = vadd.f32 %v1266_v61, %v2758_v16  ;;  %v1328_v61 = vmul.f32 %v2710_v0, %v2710_v0  ;;  %v1389_v49 = vadd.f32 %v1388_v54, %v1326_v51  ;;  %v3191_v51 = vld [vmem:[#allocation48_spill] sm:$0xff]  ;;  %v1207_v17 = vsel %vm1015_vm12, %v820_v7, 0.0 }
 0x1fc   : > { %v822_v54 = vsub.f32 %v3191_v51, %v2265_v8  ;;  %v1330_v41 = vmul.f32 %v2724_v63, %v2724_v63  ;;  %v892_v45 = vadd.s32 240, %v2137_v22  ;;  %v955_v5 = vadd.s32 %v2142_v24, %v890_v12 }
 0x1fd   : > { %v1268_v3 = vadd.f32 %v1267_v6, %v2767_v47  ;;  %v1329_v6 = vmul.f32 %v2717_v13, %v2717_v13  ;;  %v1390_v4 = vadd.f32 %v1389_v49, %v1327_v39  ;;  %vm1017_vm14 = vcmp.lt.s32.totalorder %v953_v28, 1000  ;;  %v3192_v39 = vld [vmem:[#allocation52_spill] sm:$0xff] }
 0x1fe   : > { %v823_v49 = vsub.f32 %v3192_v39, %v2265_v8  ;;  %v1208_v58 = vsel %vm1016_vm13, %v821_v2, 0.0  ;;  %v1331_v34 = vmul.f32 %v2731_v53, %v2731_v53  ;;  %v893_v7 = vadd.s32 248, %v2137_v22 }
 0x1ff   : > { %v1269_v35 = vadd.f32 %v1268_v3, %v1205_v62  ;;  %v1391_v3 = vadd.f32 %v1390_v4, %v1328_v61  ;;  %v956_v51 = vadd.s32 %v2142_v24, %v891_v1  ;;  %vm1018_vm15 = vcmp.lt.s32.totalorder %v954_v57, 1000  ;;  %v3193_v61 = vld [vmem:[#allocation58_spill] sm:$0xff] }
 0x200   : > { %v824_v4 = vsub.f32 %v3193_v61, %v2265_v8  ;;  %v1209_v12 = vsel %vm1017_vm14, %v822_v54, 0.0  ;;  %v1332_v28 = vmul.f32 %v2740_v38, %v2740_v38  ;;  %v894_v2 = vadd.s32 256, %v2137_v22  ;;  %v3195_v38 = vld [vmem:[#allocation56_spill] sm:$0xff] }
 0x201   : > { %v1270_v0 = vadd.f32 %v1269_v35, %v1206_v60  ;;  %v1392_v35 = vadd.f32 %v1391_v3, %v1329_v6  ;;  %v957_v39 = vadd.s32 %v2142_v24, %v892_v45  ;;  %vm1019_vm0 = vcmp.lt.s32.totalorder %v955_v5, 1000  ;;  %v3194_v6 = vld [vmem:[#allocation62_spill] sm:$0xff] }
 0x202   : > { %v825_v3 = vsub.f32 %v3194_v6, %v2265_v8  ;;  %v1210_v1 = vsel %vm1018_vm15, %v823_v49, 0.0  ;;  %v1333_v57 = vmul.f32 %v2749_v43, %v2749_v43  ;;  %v958_v54 = vadd.s32 %v2142_v24, %v893_v7 }
 0x203   : > { %v1271_v13 = vadd.f32 %v1270_v0, %v1207_v17  ;;  %v1393_v0 = vadd.f32 %v1392_v35, %v1330_v41  ;;  %vm1020_vm1 = vcmp.lt.s32.totalorder %v956_v51, 1000  ;;  %v826_v41 = vsub.f32 %v3195_v38, %v2265_v8 }
 0x204   : > { %v1211_v22 = vsel %vm1019_vm0, %v824_v4, 0.0  ;;  %v1334_v45 = vmul.f32 %v2758_v16, %v2758_v16  ;;  %v959_v35 = vadd.s32 %v2142_v24, %v894_v2  ;;  %vm1021_vm2 = vcmp.lt.s32.totalorder %v957_v39, 1000  ;;  %v3197_v4 = vld [vmem:[#allocation12_spill] sm:$0xff] }
 0x205   : > { %v1272_v63 = vadd.f32 %v1271_v13, %v1208_v58  ;;  %v1394_v13 = vadd.f32 %v1393_v0, %v1331_v34  ;;  %v1212_v34 = vsel %vm1020_vm1, %v825_v3, 0.0  ;;  %v1335_v7 = vmul.f32 %v2767_v47, %v2767_v47 }
 0x206   : > { %vm1022_vm3 = vcmp.lt.s32.totalorder %v958_v54, 1000  ;;  %v1213_v6 = vsel %vm1021_vm2, %v826_v41, 0.0  ;;  %v1336_v16 = vmul.f32 %v1205_v62, %v1205_v62  ;;  %vm1023_vm4 = vcmp.lt.s32.totalorder %v959_v35, 1000 }
 0x207   : > { %v1273_v53 = vadd.f32 %v1272_v63, %v1209_v12  ;;  %v1395_v5 = vadd.f32 %v1394_v13, %v1332_v28  ;;  %v3196_v63 = vld [vmem:[#allocation60_spill] sm:$0xff]  ;;  %v1337_v39 = vmul.f32 %v1206_v60, %v1206_v60  ;;  %v1338_v3 = vmul.f32 %v1207_v17, %v1207_v17 }
 0x208   : > { %v827_v43 = vsub.f32 %v3196_v63, %v2265_v8  ;;  %v1339_v47 = vmul.f32 %v1208_v58, %v1208_v58  ;;  %v1341_v62 = vmul.f32 %v1210_v1, %v1210_v1  ;;  %v1342_v35 = vmul.f32 %v1211_v22, %v1211_v22 }
 0x209   : > { %v1274_v61 = vadd.f32 %v1273_v53, %v1210_v1  ;;  %v1396_v51 = vadd.f32 %v1395_v5, %v1333_v57  ;;  %v828_v53 = vsub.f32 %v3197_v4, %v2265_v8  ;;  %v1340_v5 = vmul.f32 %v1209_v12, %v1209_v12 }
 0x20a   : > { %v1214_v2 = vsel %vm1022_vm3, %v827_v43, 0.0  ;;  %v1344_v58 = vmul.f32 %v1213_v6, %v1213_v6 }
 0x20b   : > { %v1275_v49 = vadd.f32 %v1274_v61, %v1211_v22  ;;  %v1397_v28 = vadd.f32 %v1396_v51, %v1334_v45  ;;  %v1215_v38 = vsel %vm1023_vm4, %v828_v53, 0.0  ;;  %v1345_v12 = vmul.f32 %v1214_v2, %v1214_v2 }
 0x20c   : > { %v1346_v1 = vmul.f32 %v1215_v38, %v1215_v38  ;;  %v1347_v22 = vmul.f32 %v2413_v59, %v2413_v59 }
 0x20d   : > { %v1276_v0 = vadd.f32 %v1275_v49, %v1212_v34  ;;  %v1398_v13 = vadd.f32 %v1397_v28, %v1335_v7  ;;  %v1343_v7 = vmul.f32 %v1212_v34, %v1212_v34 }
 0x20f   : > { %v1277_v24 = vadd.f32 %v1276_v0, %v1213_v6  ;;  %v1399_v63 = vadd.f32 %v1398_v13, %v1336_v16  ;;  %v1348_v6 = vmul.f32 %v2420_v36, %v2420_v36 }
 0x211   : > { %v1278_v61 = vadd.f32 %v1277_v24, %v1214_v2  ;;  %v1400_v57 = vadd.f32 %v1399_v63, %v1337_v39  ;;  %v1349_v2 = vmul.f32 %v2427_v55, %v2427_v55 }
 0x213   : > { %v1279_v9 = vadd.f32 %v1278_v61, %v1215_v38  ;;  %v1401_v49 = vadd.f32 %v1400_v57, %v1338_v3  ;;  %v1350_v3 = vmul.f32 %v2434_v50, %v2434_v50 }
 0x215   : > { %v1280_v54 = vadd.f32 %v1279_v9, %v2413_v59  ;;  %v1402_v41 = vadd.f32 %v1401_v49, %v1339_v47  ;;  %v1351_v47 = vmul.f32 %v2441_v56, %v2441_v56  ;;  %v1353_v49 = vmul.f32 %v2455_v46, %v2455_v46 }
 0x217   : > { %v1281_v8 = vadd.f32 %v1280_v54, %v2420_v36  ;;  %v1403_v60 = vadd.f32 %v1402_v41, %v1340_v5  ;;  %v1352_v54 = vmul.f32 %v2448_v52, %v2448_v52 }
 0x219   : > { %v1282_v45 = vadd.f32 %v1281_v8, %v2427_v55  ;;  %v1404_v17 = vadd.f32 %v1403_v60, %v1341_v62  ;;  %v1354_v62 = vmul.f32 %v2462_v42, %v2462_v42  ;;  %v1356_v60 = vmul.f32 %v2476_v44, %v2476_v44 }
 0x21b   : > { %v1283_v43 = vadd.f32 %v1282_v45, %v2434_v50  ;;  %v1405_v0 = vadd.f32 %v1404_v17, %v1342_v35  ;;  %v1355_v45 = vmul.f32 %v2469_v48, %v2469_v48 }
 0x21d   : > { %v1284_v51 = vadd.f32 %v1283_v43, %v2441_v56  ;;  %v1406_v4 = vadd.f32 %v1405_v0, %v1343_v7  ;;  %v1357_v7 = vmul.f32 %v2483_v18, %v2483_v18  ;;  %v1359_v0 = vmul.f32 %v2497_v14, %v2497_v14 }
 0x21f   : > { %v1285_v9 = vadd.f32 %v1284_v51, %v2448_v52  ;;  %v1407_v16 = vadd.f32 %v1406_v4, %v1344_v58  ;;  %v1358_v51 = vmul.f32 %v2490_v20, %v2490_v20 }
 0x221   : > { %v1286_v53 = vadd.f32 %v1285_v9, %v2455_v46  ;;  %v1408_v24 = vadd.f32 %v1407_v16, %v1345_v12  ;;  %v1360_v12 = vmul.f32 %v2504_v10, %v2504_v10  ;;  %v1362_v16 = vmul.f32 %v2518_v23, %v2518_v23 }
 0x223   : > { %v1287_v28 = vadd.f32 %v1286_v53, %v2462_v42  ;;  %v1409_v39 = vadd.f32 %v1408_v24, %v1346_v1  ;;  %v1361_v53 = vmul.f32 %v2511_v32, %v2511_v32 }
 0x225   : > { %v1288_v34 = vadd.f32 %v1287_v28, %v2469_v48  ;;  %v1410_v61 = vadd.f32 %v1409_v39, %v1347_v22  ;;  %v1363_v22 = vmul.f32 %v2525_v27, %v2525_v27  ;;  %v1365_v39 = vmul.f32 %v2539_v25, %v2539_v25 }
 0x227   : > { %v1289_v13 = vadd.f32 %v1288_v34, %v2476_v44  ;;  %v1411_v63 = vadd.f32 %v1410_v61, %v1348_v6  ;;  %v1364_v34 = vmul.f32 %v2532_v29, %v2532_v29 }
 0x229   : > { %v1290_v38 = vadd.f32 %v1289_v13, %v2483_v18  ;;  %v1412_v57 = vadd.f32 %v1411_v63, %v1349_v2  ;;  %v1366_v2 = vmul.f32 %v2546_v31, %v2546_v31  ;;  %v1368_v63 = vmul.f32 %v2560_v33, %v2560_v33 }
 0x22b   : > { %v1291_v59 = vadd.f32 %v1290_v38, %v2490_v20  ;;  %v1413_v5 = vadd.f32 %v1412_v57, %v1350_v3  ;;  %v1367_v38 = vmul.f32 %v2553_v21, %v2553_v21  ;;  %v1247_v57 = vld [vmem:[#allocation3] sm:$0xff] }
 0x22d   : > { %v1292_v36 = vadd.f32 %v1291_v59, %v2497_v14  ;;  %v1414_v8 = vadd.f32 %v1413_v5, %v1351_v47 }
 0x22f   : > { %v1293_v55 = vadd.f32 %v1292_v36, %v2504_v10  ;;  %v1415_v41 = vadd.f32 %v1414_v8, %v1352_v54  ;;  %v1369_v36 = vmul.f32 %v2567_v15, %v2567_v15  ;;  %v3199_v54 = vld [vmem:[#allocation63_spill] sm:$0xff]  ;;  %v1371_v8 = vmul.f32 %v2581_v11, %v2581_v11 }
 0x231   : > { %v1294_v50 = vadd.f32 %v1293_v55, %v2511_v32  ;;  %v1416_v35 = vadd.f32 %v1415_v41, %v1353_v49  ;;  %v1370_v55 = vmul.f32 %v2574_v37, %v2574_v37 }
 0x233   : > { %v1295_v56 = vadd.f32 %v1294_v50, %v2518_v23  ;;  %v1417_v43 = vadd.f32 %v1416_v35, %v1354_v62 }
 0x235   : > { %v1296_v52 = vadd.f32 %v1295_v56, %v2525_v27  ;;  %v1418_v17 = vadd.f32 %v1417_v43, %v1355_v45  ;;  %v1374_v56 = vmul.f32 %v2602_v26, %v2602_v26 }
 0x237   : > { %v1297_v46 = vadd.f32 %v1296_v52, %v2532_v29  ;;  %v1419_v58 = vadd.f32 %v1418_v17, %v1356_v60 }
 0x239   : > { %v1298_v42 = vadd.f32 %v1297_v46, %v2539_v25  ;;  %v1420_v9 = vadd.f32 %v1419_v58, %v1357_v7  ;;  %v3198_v25 = vld [vmem:[#allocation59_spill] sm:$0xff]  ;;  %v1313_v46 = vld [vmem:[#allocation4] sm:$0xff] }
 0x23b   : > { %v1299_v48 = vadd.f32 %v1298_v42, %v2546_v31  ;;  %v1421_v4 = vadd.f32 %v1420_v9, %v1358_v51 }
 0x23d   : > { %v1300_v44 = vadd.f32 %v1299_v48, %v2553_v21  ;;  %v1422_v1 = vadd.f32 %v1421_v4, %v1359_v0 }
 0x23f   : > { %v1301_v18 = vadd.f32 %v1300_v44, %v2560_v33  ;;  %v1423_v28 = vadd.f32 %v1422_v1, %v1360_v12  ;;  %v1372_v33 = vmul.f32 %v2588_v30, %v2588_v30 }
 0x241   : > { %v1302_v20 = vadd.f32 %v1301_v18, %v2567_v15  ;;  %v1424_v24 = vadd.f32 %v1423_v28, %v1361_v53  ;;  %v1373_v15 = vmul.f32 %v2595_v40, %v2595_v40 }
 0x243   : > { %v1303_v14 = vadd.f32 %v1302_v20, %v2574_v37  ;;  %v1425_v6 = vadd.f32 %v1424_v24, %v1362_v16  ;;  %v1375_v37 = vmul.f32 %v2609_v19, %v2609_v19 }
 0x245   : > { %v1304_v10 = vadd.f32 %v1303_v14, %v2581_v11  ;;  %v1426_v13 = vadd.f32 %v1425_v6, %v1363_v22  ;;  %v1376_v11 = vmul.f32 %v3198_v25, %v3198_v25 }
 0x247   : > { %v1305_v32 = vadd.f32 %v1304_v10, %v2588_v30  ;;  %v1427_v61 = vadd.f32 %v1426_v13, %v1364_v34  ;;  %v1377_v30 = vmul.f32 %v3199_v54, %v3199_v54 }
 0x249   : > { %v1306_v23 = vadd.f32 %v1305_v32, %v2595_v40  ;;  %v1428_v3 = vadd.f32 %v1427_v61, %v1365_v39 }
 0x24b   : > { %v1307_v27 = vadd.f32 %v1306_v23, %v2602_v26  ;;  %v1429_v59 = vadd.f32 %v1428_v3, %v1366_v2 }
 0x24d   : > { %v1308_v29 = vadd.f32 %v1307_v27, %v2609_v19  ;;  %v1430_v31 = vadd.f32 %v1429_v59, %v1367_v38 }
 0x24f   : > { %v1309_v47 = vadd.f32 %v1308_v29, %v3198_v25  ;;  %v1431_v21 = vadd.f32 %v1430_v31, %v1368_v63 }
 0x251   : > { %v1310_v5 = vadd.f32 %v1309_v47, %v3199_v54  ;;  %v1432_v50 = vadd.f32 %v1431_v21, %v1369_v36 }
 0x253   : > { %v1311_v49 = vadd.f32 %v1310_v5, %v1247_v57  ;;  %v1433_v62 = vadd.f32 %v1432_v50, %v1370_v55 }
 0x255   : > { %1312 = vst [vmem:[#allocation3] sm:$0xff] %v1311_v49  ;;  %v1434_v41 = vadd.f32 %v1433_v62, %v1371_v8 }
 0x257   : > { %v1435_v45 = vadd.f32 %v1434_v41, %v1372_v33 }
 0x259   : > { %v1436_v35 = vadd.f32 %v1435_v45, %v1373_v15 }
 0x25b   : > { %v1437_v52 = vadd.f32 %v1436_v35, %v1374_v56 }
 0x25d   : > { %v1438_v60 = vadd.f32 %v1437_v52, %v1375_v37 }
 0x25f   : > { %v1439_v43 = vadd.f32 %v1438_v60, %v1376_v11 }
 0x261   : > { %v1440_v40 = vadd.f32 %v1439_v43, %v1377_v30  ;;  %1446 = sbr.rel (%p1588_p5) target bundleno = 662 (0x296), region = 44 }
 0x263   : > { %v1441_v7 = vadd.f32 %v1440_v40, %v1313_v46 }
 0x265   : > { %1442 = vst [vmem:[#allocation4] sm:$0xff] %v1441_v7 }
 0x266   : > { %v1449_v26 = vld [vmem:[#allocation3] sm:$0xff]  ;;  %v1465_v24 = vld [vmem:[#allocation2] sm:$0x1] }
 0x267   : > { %v1450_v19 = vrot.slane %v1449_v26, 4  ;;  %v1447_v10 = vld [vmem:[%s2948_s2] sm:$0x1] }
 0x268   : > { %v1448_v39 = vld [vmem:[%s2949_s3] sm:$0x1] }
 0x269   : > { %v1451_v51 = vadd.f32 %v1450_v19, %v1449_v26 }
 0x26b   : > { %v1452_v48 = vrot.slane %v1451_v51, 2 }
 0x26c   : > { %v1457_v17 = vld [vmem:[#allocation4] sm:$0xff] }
 0x26d   : > { %v1458_v42 = vrot.slane %v1457_v17, 4  ;;  %v1453_v9 = vadd.f32 %v1452_v48, %v1451_v51 }
 0x26f   : > { %v1459_v58 = vadd.f32 %v1458_v42, %v1457_v17  ;;  %v1454_v12 = vrot.slane %v1453_v9, 1 }
 0x271   : > { %v1460_v0 = vrot.slane %v1459_v58, 2  ;;  %v1455_v18 = vadd.f32 %v1454_v12, %v1453_v9 }
 0x273   : > { %v1461_v44 = vadd.f32 %v1460_v0, %v1459_v58  ;;  %v1456_v1 = vmul.f32 0.001, %v1455_v18 }
 0x275   : > { %v1462_v4 = vrot.slane %v1461_v44, 1  ;;  %v1467_v16 = vmul.f32 %v1456_v1, %v1456_v1  ;;  %v1466_v34 = vadd.f32 %v1465_v24, %v1456_v1 }
 0x277   : > { %v1463_v53 = vadd.f32 %v1462_v4, %v1461_v44 }
 0x279   : > { %v1464_v20 = vmul.f32 0.001, %v1463_v53 }
 0x27b   : > { %v1468_v28 = vsub.f32 %v1464_v20, %v1467_v16 }
 0x27d   : > { %v1469_v14 = vmax.f32 %v1468_v28, 0.0 }
 0x27f   : > { %v1470_v22 = vadd.f32 1e-05, %v1469_v14 }
 0x281   : > { %1726 = vrsqrt.f32 %v1470_v22 }
 0x28e   : > { %v1727_v6 = vpop.eup %1726 }
 0x28f   : > { %v1472_v32 = vmul.f32 %v1727_v6, %v1447_v10 }
 0x291   : > { %1473 = vst [vmem:[#allocation5] sm:$0x1] %v1472_v32  ;;  %v1474_v13 = vmul.f32 %v1472_v32, %v1466_v34 }
 0x293   : > { %v1475_v23 = vsub.f32 %v1448_v39, %v1474_v13 }
 0x295   : > { %1476 = vst [vmem:[#allocation7] sm:$0x1] %v1475_v23 }
 0x296 PF: > { %p1709_p6 = scmp.eq.s32.totalorder %s1831_s19, 1  ;;  %s1793_s9 = smov [#allocation5]  }
 0x297   : > { %s1484_s10 = sshll.u32 %s1793_s9, 4  ;;  %s1794_s11 = smov [#allocation7]   ;;  %s1485_s10 = int_to_ptr.vmem [resolvable:$true] %s1484_s10 }
 0x298   : > { %s1495_s12 = sshll.u32 %s1794_s11, 4  ;;  %s1728_s13 = scalar_lea.vmem %s1485_s10, 16  ;;  %s1496_s12 = int_to_ptr.vmem [resolvable:$true] %s1495_s12 }
 0x299   : > { %p1729_p7 = scmp.ne.s32.totalorder %s1485_s10, %s1728_s13  ;;  %s1734_s14 = scalar_lea.vmem %s1485_s10, 32 }
 0x29a   : > { %p1735_p10 = scmp.lt.s32.totalorder %s1485_s10, %s1485_s10  ;;  %p1736_p11 = scmp.lt.s32.totalorder %s1734_s14, %s1728_s13 }
 0x29b   : > { %p1730_p8 = pnand %p1729_p7, %p1709_p6 }
 0x29c   : > { %p1737_p12 = por %p1736_p11, %p1735_p10 }
 0x29d   : > { %p1731_p9 = pneg %p1730_p8 }
 0x29f   : > { %p1738_p13 = pnand %p1737_p12, %p1731_p9 }
 0x2a1   : > { %1741 = shalt.err (!%p1738_p13)
}
 0x2a2   : > { %1702 = dma.vmem_to_hbm [thread:$0]  (%p1709_p6), %s1485_s10, 16, %s2950_s4, [#allocation6]  }
 0x2a3   : > { %s1752_s17 = scalar_lea.vmem %s1496_s12, 16  ;;  %s1758_s20 = scalar_lea.vmem %s1496_s12, 32 }
 0x2a4   : > { %p1753_p0 = scmp.ne.s32.totalorder %s1496_s12, %s1752_s17  ;;  %p1759_p3 = scmp.lt.s32.totalorder %s1496_s12, %s1496_s12 }
 0x2a5   : > { %p1760_p4 = scmp.lt.s32.totalorder %s1758_s20, %s1752_s17 }
 0x2a6   : > { %p1754_p1 = pnand %p1753_p0, %p1709_p6 }
 0x2a7   : > { %p1761_p5 = por %p1760_p4, %p1759_p3 }
 0x2a8   : > { %p1755_p2 = pneg %p1754_p1 }
 0x2aa   : > { %p1762_p7 = pnand %p1761_p5, %p1755_p2 }
 0x2ac   : > { %1765 = shalt.err (!%p1762_p7)
}
 0x2ad   : > { %1704 = dma.vmem_to_hbm [thread:$0]  (%p1709_p6), %s1496_s12, 16, %s2951_s5, [#allocation8]  }
 0x2ae   : > { %1781 = dma.done.wait (%p1709_p6), [#allocation6], 16  }
 0x2af   : > { %1783 = vsyncadd (%p1709_p6), [#allocation6], 4294967280 }
 0x2b0   : > { %1785 = dma.done.wait (%p1709_p6), [#allocation8], 16  }
 0x2b1   : > { %1787 = vsyncadd (%p1709_p6), [#allocation8], 4294967280 }
 0x2b2 PF: > { %s18_s18 = sadd.s32 1, %s1790_s18  }
 0x2b3   : > { %p15_p8 = scmp.ge.s32.totalorder %s18_s18, 4  }
 0x2b5   :  { %17 = sbr.rel (!%p15_p8) target bundleno = 2 (0x2), region = 79 }
 0x2ba   :  { %1512 = vsyncpa [#allocation6], 1 }
 0x2bb   :  { %1514 = vsyncpa [#allocation6 + $0x1], 1 }
 0x2bc   :  { %1515 = vsyncpa [#allocation8], 1 }

</bundles_post_ra>
